<compile_context>
chip_gen: v7x
topology: tpu7x:2x2x1
jax: 0.10.0
libtpu: 0.0.40
codegen_flags: <defaults>
</compile_context>

<pallas_src>
import math

import jax
import jax.numpy as jnp
from jax.experimental import pallas as pl
from jax.experimental.pallas import tpu as pltpu

# ---- small hyper-parameters consistent with the module's structure ----
VOCAB = 128          # multiple of 128 -> lane-dense logits output
HIDDEN = 32
NUM_HEADS = 4
HEAD_DIM = HIDDEN // NUM_HEADS
INTER = 64
NUM_LAYERS = 2
MAX_LEN = 16
LN_EPS = 1e-5        # nn.LayerNorm default eps
NEG_INF = -1e30      # additive mask value (exp underflows to exactly 0)


# ---------------------------------------------------------------------------
# in-kernel helpers
# ---------------------------------------------------------------------------
def _layer_norm(x, gamma, beta):
    mu = jnp.mean(x, axis=-1, keepdims=True)
    var = jnp.mean(jnp.square(x - mu), axis=-1, keepdims=True)
    return (x - mu) * jax.lax.rsqrt(var + LN_EPS) * gamma + beta


def _gelu_tanh(x):
    # tanh-approx GELU (EUP tanh); |err| vs exact erf-GELU < ~1e-3 abs, far below test tol.
    c = math.sqrt(2.0 / math.pi)
    return 0.5 * x * (1.0 + jnp.tanh(c * (x + 0.044715 * x * x * x)))


# ---------------------------------------------------------------------------
# Fused encoder kernel: one grid step == one batch element, all layers + MLM head
# ---------------------------------------------------------------------------
def encoder_kernel(x_ref, bias_ref,
                   ln1_g_ref, ln1_b_ref, wqkv_ref, bqkv_ref, wo_ref, bo_ref,
                   ln2_g_ref, ln2_b_ref, w1_ref, b1_ref, w2_ref, b2_ref,
                   lnf_g_ref, lnf_b_ref, wm_ref, bm_ref,
                   out_ref):
    f32, bf16 = jnp.float32, jnp.bfloat16
    x = x_ref[0].astype(f32)          # (L, H) residual stream, kept in f32
    bias = bias_ref[0]                # (1, L) additive key mask: 0 or -1e30
    scale = 1.0 / math.sqrt(HEAD_DIM)

    for l in range(NUM_LAYERS):       # static unroll; weights are VMEM-resident
        # ---------------- attention sub-layer (pre-LN) ----------------
        xn = _layer_norm(x, ln1_g_ref[l], ln1_b_ref[l])
        qkv = jnp.dot(xn.astype(bf16), wqkv_ref[l],
                      preferred_element_type=f32) + bqkv_ref[l]          # (L, 3H)
        q = qkv[:, 0 * HIDDEN:1 * HIDDEN]
        k = qkv[:, 1 * HIDDEN:2 * HIDDEN]
        v = qkv[:, 2 * HIDDEN:3 * HIDDEN]

        # head-major (NH, L, HD) operands -> 2 batched contractions for all heads
        q3 = jnp.stack([q[:, h * HEAD_DIM:(h + 1) * HEAD_DIM] for h in range(NUM_HEADS)], axis=0)
        k3 = jnp.stack([k[:, h * HEAD_DIM:(h + 1) * HEAD_DIM] for h in range(NUM_HEADS)], axis=0)
        v3 = jnp.stack([v[:, h * HEAD_DIM:(h + 1) * HEAD_DIM] for h in range(NUM_HEADS)], axis=0)

        scores = jnp.einsum('hqd,hkd->hqk', q3.astype(bf16), k3.astype(bf16),
                            preferred_element_type=f32) * scale          # (NH, L, L)
        scores = scores + bias                                           # masked_fill as add
        m = jnp.max(scores, axis=-1, keepdims=True)
        e = jnp.exp(scores - m)
        denom = jnp.sum(e, axis=-1, keepdims=True)
        attn = e * pl.reciprocal(denom, approx=True)                     # EUP reciprocal

        ctx3 = jnp.einsum('hqk,hkd->hqd', attn.astype(bf16), v3.astype(bf16),
                          preferred_element_type=f32)                    # (NH, L, HD)
        ctx = jnp.concatenate([ctx3[h] for h in range(NUM_HEADS)], axis=-1)  # (L, H)

        attn_out = jnp.dot(ctx.astype(bf16), wo_ref[l],
                           preferred_element_type=f32) + bo_ref[l]
        x = x + attn_out                                                 # dropout = identity

        # ---------------- feed-forward sub-layer (pre-LN) ----------------
        xn2 = _layer_norm(x, ln2_g_ref[l], ln2_b_ref[l])
        h1 = jnp.dot(xn2.astype(bf16), w1_ref[l],
                     preferred_element_type=f32) + b1_ref[l]
        h1 = _gelu_tanh(h1)
        ffn = jnp.dot(h1.astype(bf16), w2_ref[l],
                      preferred_element_type=f32) + b2_ref[l]
        x = x + ffn

    # ---------------- final LayerNorm + MLM head ----------------
    xf = _layer_norm(x, lnf_g_ref[...], lnf_b_ref[...])
    logits = jnp.dot(xf.astype(bf16), wm_ref[...],
                     preferred_element_type=f32) + bm_ref[...]           # (L, V), V = 128
    out_ref[0] = logits.astype(out_ref.dtype)


# ---------------------------------------------------------------------------
# Wrapper: embeddings (plain-JAX gather glue) + single fused pallas_call
# ---------------------------------------------------------------------------
def _stack(layers, name):
    return jnp.stack([lyr[name] for lyr in layers], axis=0)


@jax.jit
def encoder_forward(params, input_ids, token_type_ids, attention_mask):
    B, L = input_ids.shape
    f32, bf16 = jnp.float32, jnp.bfloat16
    H, V, NL, I = HIDDEN, VOCAB, NUM_LAYERS, INTER

    # TODO(synk): embedding gathers (data-dependent row gather) stay as plain-JAX glue.
    positions = jnp.arange(L, dtype=jnp.int32)
    x = (jnp.take(params["token_emb"], input_ids, axis=0)
         + jnp.take(params["pos_emb"], positions, axis=0)[None, :, :]
         + jnp.take(params["type_emb"], token_type_ids, axis=0)).astype(f32)

    # additive key mask: 0 where attended, -1e30 where attention_mask == 0
    bias = jnp.where(attention_mask == 0, NEG_INF, 0.0).astype(f32).reshape(B, 1, L)

    layers = params["layers"]
    ln1_g, ln1_b = _stack(layers, "ln1_g"), _stack(layers, "ln1_b")
    wqkv = _stack(layers, "wqkv").astype(bf16)
    bqkv = _stack(layers, "bqkv")
    wo, bo = _stack(layers, "wo").astype(bf16), _stack(layers, "bo")
    ln2_g, ln2_b = _stack(layers, "ln2_g"), _stack(layers, "ln2_b")
    w1, b1 = _stack(layers, "w1").astype(bf16), _stack(layers, "b1")
    w2, b2 = _stack(layers, "w2").astype(bf16), _stack(layers, "b2")
    lnf_g, lnf_b = params["ln_g"], params["ln_b"]
    wm, bm = params["mlm_w"].astype(bf16), params["mlm_b"]

    def fixed3(a, b_, c):
        return pl.BlockSpec((a, b_, c), lambda i: (0, 0, 0))

    def fixed2(a, b_):
        return pl.BlockSpec((a, b_), lambda i: (0, 0))

    in_specs = [
        pl.BlockSpec((1, L, H), lambda i: (i, 0, 0)),    # x
        pl.BlockSpec((1, 1, L), lambda i: (i, 0, 0)),    # additive mask bias
        fixed3(NL, 1, H), fixed3(NL, 1, H),              # ln1 gamma/beta (stacked)
        fixed3(NL, H, 3 * H), fixed3(NL, 1, 3 * H),      # Wqkv, bqkv
        fixed3(NL, H, H), fixed3(NL, 1, H),              # Wo, bo
        fixed3(NL, 1, H), fixed3(NL, 1, H),              # ln2 gamma/beta
        fixed3(NL, H, I), fixed3(NL, 1, I),              # W1, b1
        fixed3(NL, I, H), fixed3(NL, 1, H),              # W2, b2
        fixed2(1, H), fixed2(1, H),                      # final LN gamma/beta
        fixed2(H, V), fixed2(1, V),                      # MLM head W, b
    ]

    logits = pl.pallas_call(
        encoder_kernel,
        out_shape=jax.ShapeDtypeStruct((B, L, V), f32),
        grid=(B,),
        in_specs=in_specs,
        out_specs=pl.BlockSpec((1, L, V), lambda i: (i, 0, 0)),
        compiler_params=pltpu.CompilerParams(dimension_semantics=("parallel",)),
    )(x, bias,
      ln1_g, ln1_b, wqkv, bqkv, wo, bo,
      ln2_g, ln2_b, w1, b1, w2, b2,
      lnf_g, lnf_b, wm, bm)
    return logits


# ---------------------------------------------------------------------------
# Pure-JAX f32 reference (mirrors the PyTorch module, eval mode) for validation
# ---------------------------------------------------------------------------
def encoder_reference(params, input_ids, token_type_ids, attention_mask):
    B, L = input_ids.shape
    positions = jnp.arange(L, dtype=jnp.int32)
    x = (jnp.take(params["token_emb"], input_ids, axis=0)
         + jnp.take(params["pos_emb"], positions, axis=0)[None, :, :]
         + jnp.take(params["type_emb"], token_type_ids, axis=0))
    bias = jnp.where(attention_mask == 0, NEG_INF, 0.0).astype(jnp.float32)[:, None, None, :]

    def ln(t, g, b):
        mu = jnp.mean(t, axis=-1, keepdims=True)
        var = jnp.mean(jnp.square(t - mu), axis=-1, keepdims=True)
        return (t - mu) / jnp.sqrt(var + LN_EPS) * g + b

    def heads(t):
        return t.reshape(B, L, NUM_HEADS, HEAD_DIM).transpose(0, 2, 1, 3)

    for lyr in params["layers"]:
        xn = ln(x, lyr["ln1_g"], lyr["ln1_b"])
        qkv = xn @ lyr["wqkv"] + lyr["bqkv"]
        q, k, v = jnp.split(qkv, 3, axis=-1)
        qh, kh, vh = heads(q), heads(k), heads(v)
        scores = jnp.einsum('bhqd,bhkd->bhqk', qh, kh) / math.sqrt(HEAD_DIM) + bias
        attn = jax.nn.softmax(scores, axis=-1)
        ctx = jnp.einsum('bhqk,bhkd->bhqd', attn, vh)
        ctx = ctx.transpose(0, 2, 1, 3).reshape(B, L, HIDDEN)
        x = x + (ctx @ lyr["wo"] + lyr["bo"])
        xn2 = ln(x, lyr["ln2_g"], lyr["ln2_b"])
        h1 = jax.nn.gelu(xn2 @ lyr["w1"] + lyr["b1"], approximate=False)
        x = x + (h1 @ lyr["w2"] + lyr["b2"])
    xf = ln(x, params["ln_g"], params["ln_b"])
    return xf @ params["mlm_w"] + params["mlm_b"]


# ---------------------------------------------------------------------------
# deterministic synthetic parameters
# ---------------------------------------------------------------------------
def init_params(key):
    keys = iter(jax.random.split(key, 64))

    def nrm(shape, scale=0.02):
        return scale * jax.random.normal(next(keys), shape, jnp.float32)

    params = {
        "token_emb": nrm((VOCAB, HIDDEN)),
        "pos_emb": nrm((MAX_LEN, HIDDEN)),
        "type_emb": nrm((2, HIDDEN)),
        "ln_g": jnp.ones((1, HIDDEN), jnp.float32),
        "ln_b": jnp.zeros((1, HIDDEN), jnp.float32),
        "mlm_w": nrm((HIDDEN, VOCAB)),
        "mlm_b": nrm((1, VOCAB)),
        "layers": [],
    }
    for _ in range(NUM_LAYERS):
        params["layers"].append({
            "ln1_g": jnp.ones((1, HIDDEN), jnp.float32),
            "ln1_b": jnp.zeros((1, HIDDEN), jnp.float32),
            "wqkv": nrm((HIDDEN, 3 * HIDDEN)), "bqkv": nrm((1, 3 * HIDDEN)),
            "wo": nrm((HIDDEN, HIDDEN)), "bo": nrm((1, HIDDEN)),
            "ln2_g": jnp.ones((1, HIDDEN), jnp.float32),
            "ln2_b": jnp.zeros((1, HIDDEN), jnp.float32),
            "w1": nrm((HIDDEN, INTER)), "b1": nrm((1, INTER)),
            "w2": nrm((INTER, HIDDEN)), "b2": nrm((1, HIDDEN)),
        })
    return params


if __name__ == "__main__":
    key = jax.random.PRNGKey(0)
    k_param, k_ids, k_type = jax.random.split(key, 3)

    B, L = 2, 8
    params = init_params(k_param)
    input_ids = jax.random.randint(k_ids, (B, L), 0, VOCAB, dtype=jnp.int32)
    token_type_ids = jax.random.randint(k_type, (B, L), 0, 2, dtype=jnp.int32)
    attention_mask = jnp.ones((B, L), jnp.int32).at[1, 6:].set(0)  # pad last 2 tokens of seq 1

    logits = encoder_forward(params, input_ids, token_type_ids, attention_mask)
    jax.block_until_ready(logits)
    assert logits.shape == (B, L, VOCAB)
    assert bool(jnp.all(jnp.isfinite(logits)))

    # tolerance-based check against a pure-JAX f32 reference (bf16 MXU operands,
    # approx reciprocal and tanh-GELU introduce only small deviations)
    ref = encoder_reference(params, input_ids, token_type_ids, attention_mask)
    max_err = float(jnp.max(jnp.abs(logits - ref)))
    assert max_err < 2e-2, f"max abs error vs reference too large: {max_err}"

    print("KERNEL_OK")
</pallas_src>

<mosaic_0001>
module attributes {stable_mosaic.version = 11 : i64} {
  func.func @encoder_kernel(%arg0: i32, %arg1: memref<1x8x32xf32, #tpu.memory_space<vmem>>, %arg2: memref<1x1x8xf32, #tpu.memory_space<vmem>>, %arg3: memref<2x1x32xf32, #tpu.memory_space<vmem>>, %arg4: memref<2x1x32xf32, #tpu.memory_space<vmem>>, %arg5: memref<2x32x96xbf16, #tpu.memory_space<vmem>>, %arg6: memref<2x1x96xf32, #tpu.memory_space<vmem>>, %arg7: memref<2x32x32xbf16, #tpu.memory_space<vmem>>, %arg8: memref<2x1x32xf32, #tpu.memory_space<vmem>>, %arg9: memref<2x1x32xf32, #tpu.memory_space<vmem>>, %arg10: memref<2x1x32xf32, #tpu.memory_space<vmem>>, %arg11: memref<2x32x64xbf16, #tpu.memory_space<vmem>>, %arg12: memref<2x1x64xf32, #tpu.memory_space<vmem>>, %arg13: memref<2x64x32xbf16, #tpu.memory_space<vmem>>, %arg14: memref<2x1x32xf32, #tpu.memory_space<vmem>>, %arg15: memref<1x32xf32, #tpu.memory_space<vmem>>, %arg16: memref<1x32xf32, #tpu.memory_space<vmem>>, %arg17: memref<32x128xbf16, #tpu.memory_space<vmem>>, %arg18: memref<1x128xf32, #tpu.memory_space<vmem>>, %arg19: memref<1x8x128xf32, #tpu.memory_space<vmem>>) attributes {dimension_semantics = [#tpu.dimension_semantics<parallel>], iteration_bounds = array<i64: 2>, scalar_prefetch = 0 : i64, scratch_operands = 0 : i64, tpu.core_type = #tpu.core_type<tc>, window_params = [{transform_indices = @transform_0, window_bounds = array<i64: 1, 8, 32>}, {transform_indices = @transform_1, window_bounds = array<i64: 1, 1, 8>}, {pipeline_mode = #tpu.pipeline_mode<synchronous>, transform_indices = @transform_2, window_bounds = array<i64: 2, 1, 32>}, {pipeline_mode = #tpu.pipeline_mode<synchronous>, transform_indices = @transform_3, window_bounds = array<i64: 2, 1, 32>}, {pipeline_mode = #tpu.pipeline_mode<synchronous>, transform_indices = @transform_4, window_bounds = array<i64: 2, 32, 96>}, {pipeline_mode = #tpu.pipeline_mode<synchronous>, transform_indices = @transform_5, window_bounds = array<i64: 2, 1, 96>}, {pipeline_mode = #tpu.pipeline_mode<synchronous>, transform_indices = @transform_6, window_bounds = array<i64: 2, 32, 32>}, {pipeline_mode = #tpu.pipeline_mode<synchronous>, transform_indices = @transform_7, window_bounds = array<i64: 2, 1, 32>}, {pipeline_mode = #tpu.pipeline_mode<synchronous>, transform_indices = @transform_8, window_bounds = array<i64: 2, 1, 32>}, {pipeline_mode = #tpu.pipeline_mode<synchronous>, transform_indices = @transform_9, window_bounds = array<i64: 2, 1, 32>}, {pipeline_mode = #tpu.pipeline_mode<synchronous>, transform_indices = @transform_10, window_bounds = array<i64: 2, 32, 64>}, {pipeline_mode = #tpu.pipeline_mode<synchronous>, transform_indices = @transform_11, window_bounds = array<i64: 2, 1, 64>}, {pipeline_mode = #tpu.pipeline_mode<synchronous>, transform_indices = @transform_12, window_bounds = array<i64: 2, 64, 32>}, {pipeline_mode = #tpu.pipeline_mode<synchronous>, transform_indices = @transform_13, window_bounds = array<i64: 2, 1, 32>}, {pipeline_mode = #tpu.pipeline_mode<synchronous>, transform_indices = @transform_14, window_bounds = array<i64: 1, 32>}, {pipeline_mode = #tpu.pipeline_mode<synchronous>, transform_indices = @transform_15, window_bounds = array<i64: 1, 32>}, {pipeline_mode = #tpu.pipeline_mode<synchronous>, transform_indices = @transform_16, window_bounds = array<i64: 32, 128>}, {pipeline_mode = #tpu.pipeline_mode<synchronous>, transform_indices = @transform_17, window_bounds = array<i64: 1, 128>}, {transform_indices = @transform_18, window_bounds = array<i64: 1, 8, 128>}]} {
    %c0 = arith.constant 0 : index
    %c0_0 = arith.constant 0 : index
    %c0_1 = arith.constant 0 : index
    %0 = vector.load %arg1[%c0, %c0_0, %c0_1] : memref<1x8x32xf32, #tpu.memory_space<vmem>>, vector<1x8x32xf32>
    %1 = vector.shape_cast %0 : vector<1x8x32xf32> to vector<8x32xf32>
    %c0_2 = arith.constant 0 : index
    %c0_3 = arith.constant 0 : index
    %c0_4 = arith.constant 0 : index
    %2 = vector.load %arg2[%c0_2, %c0_3, %c0_4] : memref<1x1x8xf32, #tpu.memory_space<vmem>>, vector<1x1x8xf32>
    %3 = vector.shape_cast %2 : vector<1x1x8xf32> to vector<1x8xf32>
    %c0_5 = arith.constant 0 : index
    %c0_6 = arith.constant 0 : index
    %c0_7 = arith.constant 0 : index
    %4 = vector.load %arg3[%c0_5, %c0_6, %c0_7] : memref<2x1x32xf32, #tpu.memory_space<vmem>>, vector<1x1x32xf32>
    %5 = vector.shape_cast %4 : vector<1x1x32xf32> to vector<1x32xf32>
    %c0_8 = arith.constant 0 : index
    %c0_9 = arith.constant 0 : index
    %c0_10 = arith.constant 0 : index
    %6 = vector.load %arg4[%c0_8, %c0_9, %c0_10] : memref<2x1x32xf32, #tpu.memory_space<vmem>>, vector<1x1x32xf32>
    %7 = vector.shape_cast %6 : vector<1x1x32xf32> to vector<1x32xf32>
    %cst = arith.constant dense<0.000000e+00> : vector<8xf32>
    %8 = vector.multi_reduction <add>, %1, %cst [1] : vector<8x32xf32> to vector<8xf32>
    %9 = vector.shape_cast %8 : vector<8xf32> to vector<8x1xf32>
    %cst_11 = arith.constant 3.200000e+01 : f32
    %10 = vector.broadcast %cst_11 : f32 to vector<8x1xf32>
    %11 = arith.divf %9, %10 : vector<8x1xf32>
    %12 = vector.broadcast %11 : vector<8x1xf32> to vector<8x32xf32>
    %13 = arith.subf %1, %12 : vector<8x32xf32>
    %14 = arith.mulf %13, %13 : vector<8x32xf32>
    %cst_12 = arith.constant dense<0.000000e+00> : vector<8xf32>
    %15 = vector.multi_reduction <add>, %14, %cst_12 [1] : vector<8x32xf32> to vector<8xf32>
    %16 = vector.shape_cast %15 : vector<8xf32> to vector<8x1xf32>
    %cst_13 = arith.constant 3.200000e+01 : f32
    %17 = vector.broadcast %cst_13 : f32 to vector<8x1xf32>
    %18 = arith.divf %16, %17 : vector<8x1xf32>
    %19 = vector.broadcast %11 : vector<8x1xf32> to vector<8x32xf32>
    %20 = arith.subf %1, %19 : vector<8x32xf32>
    %cst_14 = arith.constant 9.99999974E-6 : f32
    %21 = vector.broadcast %cst_14 : f32 to vector<8x1xf32>
    %22 = arith.addf %18, %21 : vector<8x1xf32>
    %23 = math.rsqrt %22 : vector<8x1xf32>
    %24 = vector.broadcast %23 : vector<8x1xf32> to vector<8x32xf32>
    %25 = arith.mulf %20, %24 : vector<8x32xf32>
    %26 = vector.broadcast %5 : vector<1x32xf32> to vector<8x32xf32>
    %27 = arith.mulf %25, %26 : vector<8x32xf32>
    %28 = vector.broadcast %7 : vector<1x32xf32> to vector<8x32xf32>
    %29 = arith.addf %27, %28 : vector<8x32xf32>
    %30 = arith.truncf %29 : vector<8x32xf32> to vector<8x32xbf16>
    %c0_15 = arith.constant 0 : index
    %c0_16 = arith.constant 0 : index
    %c0_17 = arith.constant 0 : index
    %31 = vector.load %arg5[%c0_15, %c0_16, %c0_17] : memref<2x32x96xbf16, #tpu.memory_space<vmem>>, vector<1x32x96xbf16>
    %32 = vector.shape_cast %31 : vector<1x32x96xbf16> to vector<32x96xbf16>
    %cst_18 = arith.constant dense<0.000000e+00> : vector<8x96xf32>
    %33 = tpu.matmul %30, %32, %cst_18 {dimension_numbers = #tpu.dot_dimension_numbers<[1], [0], [0], [1], [0, 0, 1, 1], [], []>} : vector<8x32xbf16>, vector<32x96xbf16>, vector<8x96xf32> -> vector<8x96xf32>
    %c0_19 = arith.constant 0 : index
    %c0_20 = arith.constant 0 : index
    %c0_21 = arith.constant 0 : index
    %34 = vector.load %arg6[%c0_19, %c0_20, %c0_21] : memref<2x1x96xf32, #tpu.memory_space<vmem>>, vector<1x1x96xf32>
    %35 = vector.shape_cast %34 : vector<1x1x96xf32> to vector<1x96xf32>
    %36 = vector.broadcast %35 : vector<1x96xf32> to vector<8x96xf32>
    %37 = arith.addf %33, %36 : vector<8x96xf32>
    %38 = vector.extract_strided_slice %37 {offsets = [0, 0], sizes = [8, 32], strides = [1, 1]} : vector<8x96xf32> to vector<8x32xf32>
    %39 = vector.extract_strided_slice %37 {offsets = [0, 32], sizes = [8, 32], strides = [1, 1]} : vector<8x96xf32> to vector<8x32xf32>
    %40 = vector.extract_strided_slice %37 {offsets = [0, 64], sizes = [8, 32], strides = [1, 1]} : vector<8x96xf32> to vector<8x32xf32>
    %41 = vector.extract_strided_slice %38 {offsets = [0, 0], sizes = [8, 8], strides = [1, 1]} : vector<8x32xf32> to vector<8x8xf32>
    %42 = vector.extract_strided_slice %38 {offsets = [0, 8], sizes = [8, 8], strides = [1, 1]} : vector<8x32xf32> to vector<8x8xf32>
    %43 = vector.extract_strided_slice %38 {offsets = [0, 16], sizes = [8, 8], strides = [1, 1]} : vector<8x32xf32> to vector<8x8xf32>
    %44 = vector.extract_strided_slice %38 {offsets = [0, 24], sizes = [8, 8], strides = [1, 1]} : vector<8x32xf32> to vector<8x8xf32>
    %45 = vector.shape_cast %41 : vector<8x8xf32> to vector<1x8x8xf32>
    %46 = vector.shape_cast %42 : vector<8x8xf32> to vector<1x8x8xf32>
    %47 = vector.shape_cast %43 : vector<8x8xf32> to vector<1x8x8xf32>
    %48 = vector.shape_cast %44 : vector<8x8xf32> to vector<1x8x8xf32>
    %49 = tpu.concatenate %45, %46, %47, %48 in 0 : vector<1x8x8xf32>, vector<1x8x8xf32>, vector<1x8x8xf32>, vector<1x8x8xf32> -> vector<4x8x8xf32>
    %50 = vector.extract_strided_slice %39 {offsets = [0, 0], sizes = [8, 8], strides = [1, 1]} : vector<8x32xf32> to vector<8x8xf32>
    %51 = vector.extract_strided_slice %39 {offsets = [0, 8], sizes = [8, 8], strides = [1, 1]} : vector<8x32xf32> to vector<8x8xf32>
    %52 = vector.extract_strided_slice %39 {offsets = [0, 16], sizes = [8, 8], strides = [1, 1]} : vector<8x32xf32> to vector<8x8xf32>
    %53 = vector.extract_strided_slice %39 {offsets = [0, 24], sizes = [8, 8], strides = [1, 1]} : vector<8x32xf32> to vector<8x8xf32>
    %54 = vector.shape_cast %50 : vector<8x8xf32> to vector<1x8x8xf32>
    %55 = vector.shape_cast %51 : vector<8x8xf32> to vector<1x8x8xf32>
    %56 = vector.shape_cast %52 : vector<8x8xf32> to vector<1x8x8xf32>
    %57 = vector.shape_cast %53 : vector<8x8xf32> to vector<1x8x8xf32>
    %58 = tpu.concatenate %54, %55, %56, %57 in 0 : vector<1x8x8xf32>, vector<1x8x8xf32>, vector<1x8x8xf32>, vector<1x8x8xf32> -> vector<4x8x8xf32>
    %59 = vector.extract_strided_slice %40 {offsets = [0, 0], sizes = [8, 8], strides = [1, 1]} : vector<8x32xf32> to vector<8x8xf32>
    %60 = vector.extract_strided_slice %40 {offsets = [0, 8], sizes = [8, 8], strides = [1, 1]} : vector<8x32xf32> to vector<8x8xf32>
    %61 = vector.extract_strided_slice %40 {offsets = [0, 16], sizes = [8, 8], strides = [1, 1]} : vector<8x32xf32> to vector<8x8xf32>
    %62 = vector.extract_strided_slice %40 {offsets = [0, 24], sizes = [8, 8], strides = [1, 1]} : vector<8x32xf32> to vector<8x8xf32>
    %63 = vector.shape_cast %59 : vector<8x8xf32> to vector<1x8x8xf32>
    %64 = vector.shape_cast %60 : vector<8x8xf32> to vector<1x8x8xf32>
    %65 = vector.shape_cast %61 : vector<8x8xf32> to vector<1x8x8xf32>
    %66 = vector.shape_cast %62 : vector<8x8xf32> to vector<1x8x8xf32>
    %67 = tpu.concatenate %63, %64, %65, %66 in 0 : vector<1x8x8xf32>, vector<1x8x8xf32>, vector<1x8x8xf32>, vector<1x8x8xf32> -> vector<4x8x8xf32>
    %68 = arith.truncf %49 : vector<4x8x8xf32> to vector<4x8x8xbf16>
    %69 = arith.truncf %58 : vector<4x8x8xf32> to vector<4x8x8xbf16>
    "tpu.trace_start"() <{level = 10 : i32, message = "hqd,hkd->hqk"}> : () -> ()
    %cst_22 = arith.constant dense<0.000000e+00> : vector<4x8x8xf32>
    %70 = tpu.matmul %68, %69, %cst_22 {dimension_numbers = #tpu.dot_dimension_numbers<[2], [2], [1], [1], [0, 0, 0, 1, 1, 1], [0], [0]>} : vector<4x8x8xbf16>, vector<4x8x8xbf16>, vector<4x8x8xf32> -> vector<4x8x8xf32>
    "tpu.trace_stop"() : () -> ()
    %cst_23 = arith.constant 0.353553385 : f32
    %71 = vector.broadcast %cst_23 : f32 to vector<4x8x8xf32>
    %72 = arith.mulf %70, %71 : vector<4x8x8xf32>
    %73 = vector.shape_cast %3 : vector<1x8xf32> to vector<1x1x8xf32>
    %74 = vector.broadcast %73 : vector<1x1x8xf32> to vector<4x8x8xf32>
    %75 = arith.addf %72, %74 : vector<4x8x8xf32>
    %cst_24 = arith.constant dense<0xFF800000> : vector<4x8xf32>
    %76 = vector.multi_reduction <maximumf>, %75, %cst_24 [2] : vector<4x8x8xf32> to vector<4x8xf32>
    %77 = vector.shape_cast %76 : vector<4x8xf32> to vector<4x8x1xf32>
    %78 = vector.broadcast %77 : vector<4x8x1xf32> to vector<4x8x8xf32>
    %79 = arith.subf %75, %78 : vector<4x8x8xf32>
    %80 = math.exp %79 : vector<4x8x8xf32>
    %cst_25 = arith.constant dense<0.000000e+00> : vector<4x8xf32>
    %81 = vector.multi_reduction <add>, %80, %cst_25 [2] : vector<4x8x8xf32> to vector<4x8xf32>
    %82 = vector.shape_cast %81 : vector<4x8xf32> to vector<4x8x1xf32>
    %83 = tpu.reciprocal %82 {approx = true} : vector<4x8x1xf32> -> vector<4x8x1xf32>
    %84 = vector.broadcast %83 : vector<4x8x1xf32> to vector<4x8x8xf32>
    %85 = arith.mulf %80, %84 : vector<4x8x8xf32>
    %86 = arith.truncf %85 : vector<4x8x8xf32> to vector<4x8x8xbf16>
    %87 = arith.truncf %67 : vector<4x8x8xf32> to vector<4x8x8xbf16>
    "tpu.trace_start"() <{level = 10 : i32, message = "hqk,hkd->hqd"}> : () -> ()
    %cst_26 = arith.constant dense<0.000000e+00> : vector<4x8x8xf32>
    %88 = tpu.matmul %86, %87, %cst_26 {dimension_numbers = #tpu.dot_dimension_numbers<[2], [1], [1], [2], [0, 0, 0, 1, 1, 2], [0], [0]>} : vector<4x8x8xbf16>, vector<4x8x8xbf16>, vector<4x8x8xf32> -> vector<4x8x8xf32>
    "tpu.trace_stop"() : () -> ()
    %89 = vector.extract_strided_slice %88 {offsets = [0, 0, 0], sizes = [1, 8, 8], strides = [1, 1, 1]} : vector<4x8x8xf32> to vector<1x8x8xf32>
    %90 = vector.shape_cast %89 : vector<1x8x8xf32> to vector<8x8xf32>
    %91 = vector.extract_strided_slice %88 {offsets = [1, 0, 0], sizes = [1, 8, 8], strides = [1, 1, 1]} : vector<4x8x8xf32> to vector<1x8x8xf32>
    %92 = vector.shape_cast %91 : vector<1x8x8xf32> to vector<8x8xf32>
    %93 = vector.extract_strided_slice %88 {offsets = [2, 0, 0], sizes = [1, 8, 8], strides = [1, 1, 1]} : vector<4x8x8xf32> to vector<1x8x8xf32>
    %94 = vector.shape_cast %93 : vector<1x8x8xf32> to vector<8x8xf32>
    %95 = vector.extract_strided_slice %88 {offsets = [3, 0, 0], sizes = [1, 8, 8], strides = [1, 1, 1]} : vector<4x8x8xf32> to vector<1x8x8xf32>
    %96 = vector.shape_cast %95 : vector<1x8x8xf32> to vector<8x8xf32>
    %97 = tpu.concatenate %90, %92, %94, %96 in 1 : vector<8x8xf32>, vector<8x8xf32>, vector<8x8xf32>, vector<8x8xf32> -> vector<8x32xf32>
    %98 = arith.truncf %97 : vector<8x32xf32> to vector<8x32xbf16>
    %c0_27 = arith.constant 0 : index
    %c0_28 = arith.constant 0 : index
    %c0_29 = arith.constant 0 : index
    %99 = vector.load %arg7[%c0_27, %c0_28, %c0_29] : memref<2x32x32xbf16, #tpu.memory_space<vmem>>, vector<1x32x32xbf16>
    %100 = vector.shape_cast %99 : vector<1x32x32xbf16> to vector<32x32xbf16>
    %cst_30 = arith.constant dense<0.000000e+00> : vector<8x32xf32>
    %101 = tpu.matmul %98, %100, %cst_30 {dimension_numbers = #tpu.dot_dimension_numbers<[1], [0], [0], [1], [0, 0, 1, 1], [], []>} : vector<8x32xbf16>, vector<32x32xbf16>, vector<8x32xf32> -> vector<8x32xf32>
    %c0_31 = arith.constant 0 : index
    %c0_32 = arith.constant 0 : index
    %c0_33 = arith.constant 0 : index
    %102 = vector.load %arg8[%c0_31, %c0_32, %c0_33] : memref<2x1x32xf32, #tpu.memory_space<vmem>>, vector<1x1x32xf32>
    %103 = vector.shape_cast %102 : vector<1x1x32xf32> to vector<1x32xf32>
    %104 = vector.broadcast %103 : vector<1x32xf32> to vector<8x32xf32>
    %105 = arith.addf %101, %104 : vector<8x32xf32>
    %106 = arith.addf %1, %105 : vector<8x32xf32>
    %c0_34 = arith.constant 0 : index
    %c0_35 = arith.constant 0 : index
    %c0_36 = arith.constant 0 : index
    %107 = vector.load %arg9[%c0_34, %c0_35, %c0_36] : memref<2x1x32xf32, #tpu.memory_space<vmem>>, vector<1x1x32xf32>
    %108 = vector.shape_cast %107 : vector<1x1x32xf32> to vector<1x32xf32>
    %c0_37 = arith.constant 0 : index
    %c0_38 = arith.constant 0 : index
    %c0_39 = arith.constant 0 : index
    %109 = vector.load %arg10[%c0_37, %c0_38, %c0_39] : memref<2x1x32xf32, #tpu.memory_space<vmem>>, vector<1x1x32xf32>
    %110 = vector.shape_cast %109 : vector<1x1x32xf32> to vector<1x32xf32>
    %cst_40 = arith.constant dense<0.000000e+00> : vector<8xf32>
    %111 = vector.multi_reduction <add>, %106, %cst_40 [1] : vector<8x32xf32> to vector<8xf32>
    %112 = vector.shape_cast %111 : vector<8xf32> to vector<8x1xf32>
    %cst_41 = arith.constant 3.200000e+01 : f32
    %113 = vector.broadcast %cst_41 : f32 to vector<8x1xf32>
    %114 = arith.divf %112, %113 : vector<8x1xf32>
    %115 = vector.broadcast %114 : vector<8x1xf32> to vector<8x32xf32>
    %116 = arith.subf %106, %115 : vector<8x32xf32>
    %117 = arith.mulf %116, %116 : vector<8x32xf32>
    %cst_42 = arith.constant dense<0.000000e+00> : vector<8xf32>
    %118 = vector.multi_reduction <add>, %117, %cst_42 [1] : vector<8x32xf32> to vector<8xf32>
    %119 = vector.shape_cast %118 : vector<8xf32> to vector<8x1xf32>
    %cst_43 = arith.constant 3.200000e+01 : f32
    %120 = vector.broadcast %cst_43 : f32 to vector<8x1xf32>
    %121 = arith.divf %119, %120 : vector<8x1xf32>
    %122 = vector.broadcast %114 : vector<8x1xf32> to vector<8x32xf32>
    %123 = arith.subf %106, %122 : vector<8x32xf32>
    %cst_44 = arith.constant 9.99999974E-6 : f32
    %124 = vector.broadcast %cst_44 : f32 to vector<8x1xf32>
    %125 = arith.addf %121, %124 : vector<8x1xf32>
    %126 = math.rsqrt %125 : vector<8x1xf32>
    %127 = vector.broadcast %126 : vector<8x1xf32> to vector<8x32xf32>
    %128 = arith.mulf %123, %127 : vector<8x32xf32>
    %129 = vector.broadcast %108 : vector<1x32xf32> to vector<8x32xf32>
    %130 = arith.mulf %128, %129 : vector<8x32xf32>
    %131 = vector.broadcast %110 : vector<1x32xf32> to vector<8x32xf32>
    %132 = arith.addf %130, %131 : vector<8x32xf32>
    %133 = arith.truncf %132 : vector<8x32xf32> to vector<8x32xbf16>
    %c0_45 = arith.constant 0 : index
    %c0_46 = arith.constant 0 : index
    %c0_47 = arith.constant 0 : index
    %134 = vector.load %arg11[%c0_45, %c0_46, %c0_47] : memref<2x32x64xbf16, #tpu.memory_space<vmem>>, vector<1x32x64xbf16>
    %135 = vector.shape_cast %134 : vector<1x32x64xbf16> to vector<32x64xbf16>
    %cst_48 = arith.constant dense<0.000000e+00> : vector<8x64xf32>
    %136 = tpu.matmul %133, %135, %cst_48 {dimension_numbers = #tpu.dot_dimension_numbers<[1], [0], [0], [1], [0, 0, 1, 1], [], []>} : vector<8x32xbf16>, vector<32x64xbf16>, vector<8x64xf32> -> vector<8x64xf32>
    %c0_49 = arith.constant 0 : index
    %c0_50 = arith.constant 0 : index
    %c0_51 = arith.constant 0 : index
    %137 = vector.load %arg12[%c0_49, %c0_50, %c0_51] : memref<2x1x64xf32, #tpu.memory_space<vmem>>, vector<1x1x64xf32>
    %138 = vector.shape_cast %137 : vector<1x1x64xf32> to vector<1x64xf32>
    %139 = vector.broadcast %138 : vector<1x64xf32> to vector<8x64xf32>
    %140 = arith.addf %136, %139 : vector<8x64xf32>
    %cst_52 = arith.constant 5.000000e-01 : f32
    %141 = vector.broadcast %cst_52 : f32 to vector<8x64xf32>
    %142 = arith.mulf %141, %140 : vector<8x64xf32>
    %cst_53 = arith.constant 4.471500e-02 : f32
    %143 = vector.broadcast %cst_53 : f32 to vector<8x64xf32>
    %144 = arith.mulf %143, %140 : vector<8x64xf32>
    %145 = arith.mulf %144, %140 : vector<8x64xf32>
    %146 = arith.mulf %145, %140 : vector<8x64xf32>
    %147 = arith.addf %140, %146 : vector<8x64xf32>
    %cst_54 = arith.constant 0.797884583 : f32
    %148 = vector.broadcast %cst_54 : f32 to vector<8x64xf32>
    %149 = arith.mulf %148, %147 : vector<8x64xf32>
    %150 = math.tanh %149 : vector<8x64xf32>
    %cst_55 = arith.constant 1.000000e+00 : f32
    %151 = vector.broadcast %cst_55 : f32 to vector<8x64xf32>
    %152 = arith.addf %151, %150 : vector<8x64xf32>
    %153 = arith.mulf %142, %152 : vector<8x64xf32>
    %154 = arith.truncf %153 : vector<8x64xf32> to vector<8x64xbf16>
    %c0_56 = arith.constant 0 : index
    %c0_57 = arith.constant 0 : index
    %c0_58 = arith.constant 0 : index
    %155 = vector.load %arg13[%c0_56, %c0_57, %c0_58] : memref<2x64x32xbf16, #tpu.memory_space<vmem>>, vector<1x64x32xbf16>
    %156 = vector.shape_cast %155 : vector<1x64x32xbf16> to vector<64x32xbf16>
    %cst_59 = arith.constant dense<0.000000e+00> : vector<8x32xf32>
    %157 = tpu.matmul %154, %156, %cst_59 {dimension_numbers = #tpu.dot_dimension_numbers<[1], [0], [0], [1], [0, 0, 1, 1], [], []>} : vector<8x64xbf16>, vector<64x32xbf16>, vector<8x32xf32> -> vector<8x32xf32>
    %c0_60 = arith.constant 0 : index
    %c0_61 = arith.constant 0 : index
    %c0_62 = arith.constant 0 : index
    %158 = vector.load %arg14[%c0_60, %c0_61, %c0_62] : memref<2x1x32xf32, #tpu.memory_space<vmem>>, vector<1x1x32xf32>
    %159 = vector.shape_cast %158 : vector<1x1x32xf32> to vector<1x32xf32>
    %160 = vector.broadcast %159 : vector<1x32xf32> to vector<8x32xf32>
    %161 = arith.addf %157, %160 : vector<8x32xf32>
    %162 = arith.addf %106, %161 : vector<8x32xf32>
    %c1 = arith.constant 1 : index
    %c0_63 = arith.constant 0 : index
    %c0_64 = arith.constant 0 : index
    %163 = vector.load %arg3[%c1, %c0_63, %c0_64] : memref<2x1x32xf32, #tpu.memory_space<vmem>>, vector<1x1x32xf32>
    %164 = vector.shape_cast %163 : vector<1x1x32xf32> to vector<1x32xf32>
    %c1_65 = arith.constant 1 : index
    %c0_66 = arith.constant 0 : index
    %c0_67 = arith.constant 0 : index
    %165 = vector.load %arg4[%c1_65, %c0_66, %c0_67] : memref<2x1x32xf32, #tpu.memory_space<vmem>>, vector<1x1x32xf32>
    %166 = vector.shape_cast %165 : vector<1x1x32xf32> to vector<1x32xf32>
    %cst_68 = arith.constant dense<0.000000e+00> : vector<8xf32>
    %167 = vector.multi_reduction <add>, %162, %cst_68 [1] : vector<8x32xf32> to vector<8xf32>
    %168 = vector.shape_cast %167 : vector<8xf32> to vector<8x1xf32>
    %cst_69 = arith.constant 3.200000e+01 : f32
    %169 = vector.broadcast %cst_69 : f32 to vector<8x1xf32>
    %170 = arith.divf %168, %169 : vector<8x1xf32>
    %171 = vector.broadcast %170 : vector<8x1xf32> to vector<8x32xf32>
    %172 = arith.subf %162, %171 : vector<8x32xf32>
    %173 = arith.mulf %172, %172 : vector<8x32xf32>
    %cst_70 = arith.constant dense<0.000000e+00> : vector<8xf32>
    %174 = vector.multi_reduction <add>, %173, %cst_70 [1] : vector<8x32xf32> to vector<8xf32>
    %175 = vector.shape_cast %174 : vector<8xf32> to vector<8x1xf32>
    %cst_71 = arith.constant 3.200000e+01 : f32
    %176 = vector.broadcast %cst_71 : f32 to vector<8x1xf32>
    %177 = arith.divf %175, %176 : vector<8x1xf32>
    %178 = vector.broadcast %170 : vector<8x1xf32> to vector<8x32xf32>
    %179 = arith.subf %162, %178 : vector<8x32xf32>
    %cst_72 = arith.constant 9.99999974E-6 : f32
    %180 = vector.broadcast %cst_72 : f32 to vector<8x1xf32>
    %181 = arith.addf %177, %180 : vector<8x1xf32>
    %182 = math.rsqrt %181 : vector<8x1xf32>
    %183 = vector.broadcast %182 : vector<8x1xf32> to vector<8x32xf32>
    %184 = arith.mulf %179, %183 : vector<8x32xf32>
    %185 = vector.broadcast %164 : vector<1x32xf32> to vector<8x32xf32>
    %186 = arith.mulf %184, %185 : vector<8x32xf32>
    %187 = vector.broadcast %166 : vector<1x32xf32> to vector<8x32xf32>
    %188 = arith.addf %186, %187 : vector<8x32xf32>
    %189 = arith.truncf %188 : vector<8x32xf32> to vector<8x32xbf16>
    %c1_73 = arith.constant 1 : index
    %c0_74 = arith.constant 0 : index
    %c0_75 = arith.constant 0 : index
    %190 = vector.load %arg5[%c1_73, %c0_74, %c0_75] : memref<2x32x96xbf16, #tpu.memory_space<vmem>>, vector<1x32x96xbf16>
    %191 = vector.shape_cast %190 : vector<1x32x96xbf16> to vector<32x96xbf16>
    %cst_76 = arith.constant dense<0.000000e+00> : vector<8x96xf32>
    %192 = tpu.matmul %189, %191, %cst_76 {dimension_numbers = #tpu.dot_dimension_numbers<[1], [0], [0], [1], [0, 0, 1, 1], [], []>} : vector<8x32xbf16>, vector<32x96xbf16>, vector<8x96xf32> -> vector<8x96xf32>
    %c1_77 = arith.constant 1 : index
    %c0_78 = arith.constant 0 : index
    %c0_79 = arith.constant 0 : index
    %193 = vector.load %arg6[%c1_77, %c0_78, %c0_79] : memref<2x1x96xf32, #tpu.memory_space<vmem>>, vector<1x1x96xf32>
    %194 = vector.shape_cast %193 : vector<1x1x96xf32> to vector<1x96xf32>
    %195 = vector.broadcast %194 : vector<1x96xf32> to vector<8x96xf32>
    %196 = arith.addf %192, %195 : vector<8x96xf32>
    %197 = vector.extract_strided_slice %196 {offsets = [0, 0], sizes = [8, 32], strides = [1, 1]} : vector<8x96xf32> to vector<8x32xf32>
    %198 = vector.extract_strided_slice %196 {offsets = [0, 32], sizes = [8, 32], strides = [1, 1]} : vector<8x96xf32> to vector<8x32xf32>
    %199 = vector.extract_strided_slice %196 {offsets = [0, 64], sizes = [8, 32], strides = [1, 1]} : vector<8x96xf32> to vector<8x32xf32>
    %200 = vector.extract_strided_slice %197 {offsets = [0, 0], sizes = [8, 8], strides = [1, 1]} : vector<8x32xf32> to vector<8x8xf32>
    %201 = vector.extract_strided_slice %197 {offsets = [0, 8], sizes = [8, 8], strides = [1, 1]} : vector<8x32xf32> to vector<8x8xf32>
    %202 = vector.extract_strided_slice %197 {offsets = [0, 16], sizes = [8, 8], strides = [1, 1]} : vector<8x32xf32> to vector<8x8xf32>
    %203 = vector.extract_strided_slice %197 {offsets = [0, 24], sizes = [8, 8], strides = [1, 1]} : vector<8x32xf32> to vector<8x8xf32>
    %204 = vector.shape_cast %200 : vector<8x8xf32> to vector<1x8x8xf32>
    %205 = vector.shape_cast %201 : vector<8x8xf32> to vector<1x8x8xf32>
    %206 = vector.shape_cast %202 : vector<8x8xf32> to vector<1x8x8xf32>
    %207 = vector.shape_cast %203 : vector<8x8xf32> to vector<1x8x8xf32>
    %208 = tpu.concatenate %204, %205, %206, %207 in 0 : vector<1x8x8xf32>, vector<1x8x8xf32>, vector<1x8x8xf32>, vector<1x8x8xf32> -> vector<4x8x8xf32>
    %209 = vector.extract_strided_slice %198 {offsets = [0, 0], sizes = [8, 8], strides = [1, 1]} : vector<8x32xf32> to vector<8x8xf32>
    %210 = vector.extract_strided_slice %198 {offsets = [0, 8], sizes = [8, 8], strides = [1, 1]} : vector<8x32xf32> to vector<8x8xf32>
    %211 = vector.extract_strided_slice %198 {offsets = [0, 16], sizes = [8, 8], strides = [1, 1]} : vector<8x32xf32> to vector<8x8xf32>
    %212 = vector.extract_strided_slice %198 {offsets = [0, 24], sizes = [8, 8], strides = [1, 1]} : vector<8x32xf32> to vector<8x8xf32>
    %213 = vector.shape_cast %209 : vector<8x8xf32> to vector<1x8x8xf32>
    %214 = vector.shape_cast %210 : vector<8x8xf32> to vector<1x8x8xf32>
    %215 = vector.shape_cast %211 : vector<8x8xf32> to vector<1x8x8xf32>
    %216 = vector.shape_cast %212 : vector<8x8xf32> to vector<1x8x8xf32>
    %217 = tpu.concatenate %213, %214, %215, %216 in 0 : vector<1x8x8xf32>, vector<1x8x8xf32>, vector<1x8x8xf32>, vector<1x8x8xf32> -> vector<4x8x8xf32>
    %218 = vector.extract_strided_slice %199 {offsets = [0, 0], sizes = [8, 8], strides = [1, 1]} : vector<8x32xf32> to vector<8x8xf32>
    %219 = vector.extract_strided_slice %199 {offsets = [0, 8], sizes = [8, 8], strides = [1, 1]} : vector<8x32xf32> to vector<8x8xf32>
    %220 = vector.extract_strided_slice %199 {offsets = [0, 16], sizes = [8, 8], strides = [1, 1]} : vector<8x32xf32> to vector<8x8xf32>
    %221 = vector.extract_strided_slice %199 {offsets = [0, 24], sizes = [8, 8], strides = [1, 1]} : vector<8x32xf32> to vector<8x8xf32>
    %222 = vector.shape_cast %218 : vector<8x8xf32> to vector<1x8x8xf32>
    %223 = vector.shape_cast %219 : vector<8x8xf32> to vector<1x8x8xf32>
    %224 = vector.shape_cast %220 : vector<8x8xf32> to vector<1x8x8xf32>
    %225 = vector.shape_cast %221 : vector<8x8xf32> to vector<1x8x8xf32>
    %226 = tpu.concatenate %222, %223, %224, %225 in 0 : vector<1x8x8xf32>, vector<1x8x8xf32>, vector<1x8x8xf32>, vector<1x8x8xf32> -> vector<4x8x8xf32>
    %227 = arith.truncf %208 : vector<4x8x8xf32> to vector<4x8x8xbf16>
    %228 = arith.truncf %217 : vector<4x8x8xf32> to vector<4x8x8xbf16>
    "tpu.trace_start"() <{level = 10 : i32, message = "hqd,hkd->hqk"}> : () -> ()
    %cst_80 = arith.constant dense<0.000000e+00> : vector<4x8x8xf32>
    %229 = tpu.matmul %227, %228, %cst_80 {dimension_numbers = #tpu.dot_dimension_numbers<[2], [2], [1], [1], [0, 0, 0, 1, 1, 1], [0], [0]>} : vector<4x8x8xbf16>, vector<4x8x8xbf16>, vector<4x8x8xf32> -> vector<4x8x8xf32>
    "tpu.trace_stop"() : () -> ()
    %cst_81 = arith.constant 0.353553385 : f32
    %230 = vector.broadcast %cst_81 : f32 to vector<4x8x8xf32>
    %231 = arith.mulf %229, %230 : vector<4x8x8xf32>
    %232 = vector.shape_cast %3 : vector<1x8xf32> to vector<1x1x8xf32>
    %233 = vector.broadcast %232 : vector<1x1x8xf32> to vector<4x8x8xf32>
    %234 = arith.addf %231, %233 : vector<4x8x8xf32>
    %cst_82 = arith.constant dense<0xFF800000> : vector<4x8xf32>
    %235 = vector.multi_reduction <maximumf>, %234, %cst_82 [2] : vector<4x8x8xf32> to vector<4x8xf32>
    %236 = vector.shape_cast %235 : vector<4x8xf32> to vector<4x8x1xf32>
    %237 = vector.broadcast %236 : vector<4x8x1xf32> to vector<4x8x8xf32>
    %238 = arith.subf %234, %237 : vector<4x8x8xf32>
    %239 = math.exp %238 : vector<4x8x8xf32>
    %cst_83 = arith.constant dense<0.000000e+00> : vector<4x8xf32>
    %240 = vector.multi_reduction <add>, %239, %cst_83 [2] : vector<4x8x8xf32> to vector<4x8xf32>
    %241 = vector.shape_cast %240 : vector<4x8xf32> to vector<4x8x1xf32>
    %242 = tpu.reciprocal %241 {approx = true} : vector<4x8x1xf32> -> vector<4x8x1xf32>
    %243 = vector.broadcast %242 : vector<4x8x1xf32> to vector<4x8x8xf32>
    %244 = arith.mulf %239, %243 : vector<4x8x8xf32>
    %245 = arith.truncf %244 : vector<4x8x8xf32> to vector<4x8x8xbf16>
    %246 = arith.truncf %226 : vector<4x8x8xf32> to vector<4x8x8xbf16>
    "tpu.trace_start"() <{level = 10 : i32, message = "hqk,hkd->hqd"}> : () -> ()
    %cst_84 = arith.constant dense<0.000000e+00> : vector<4x8x8xf32>
    %247 = tpu.matmul %245, %246, %cst_84 {dimension_numbers = #tpu.dot_dimension_numbers<[2], [1], [1], [2], [0, 0, 0, 1, 1, 2], [0], [0]>} : vector<4x8x8xbf16>, vector<4x8x8xbf16>, vector<4x8x8xf32> -> vector<4x8x8xf32>
    "tpu.trace_stop"() : () -> ()
    %248 = vector.extract_strided_slice %247 {offsets = [0, 0, 0], sizes = [1, 8, 8], strides = [1, 1, 1]} : vector<4x8x8xf32> to vector<1x8x8xf32>
    %249 = vector.shape_cast %248 : vector<1x8x8xf32> to vector<8x8xf32>
    %250 = vector.extract_strided_slice %247 {offsets = [1, 0, 0], sizes = [1, 8, 8], strides = [1, 1, 1]} : vector<4x8x8xf32> to vector<1x8x8xf32>
    %251 = vector.shape_cast %250 : vector<1x8x8xf32> to vector<8x8xf32>
    %252 = vector.extract_strided_slice %247 {offsets = [2, 0, 0], sizes = [1, 8, 8], strides = [1, 1, 1]} : vector<4x8x8xf32> to vector<1x8x8xf32>
    %253 = vector.shape_cast %252 : vector<1x8x8xf32> to vector<8x8xf32>
    %254 = vector.extract_strided_slice %247 {offsets = [3, 0, 0], sizes = [1, 8, 8], strides = [1, 1, 1]} : vector<4x8x8xf32> to vector<1x8x8xf32>
    %255 = vector.shape_cast %254 : vector<1x8x8xf32> to vector<8x8xf32>
    %256 = tpu.concatenate %249, %251, %253, %255 in 1 : vector<8x8xf32>, vector<8x8xf32>, vector<8x8xf32>, vector<8x8xf32> -> vector<8x32xf32>
    %257 = arith.truncf %256 : vector<8x32xf32> to vector<8x32xbf16>
    %c1_85 = arith.constant 1 : index
    %c0_86 = arith.constant 0 : index
    %c0_87 = arith.constant 0 : index
    %258 = vector.load %arg7[%c1_85, %c0_86, %c0_87] : memref<2x32x32xbf16, #tpu.memory_space<vmem>>, vector<1x32x32xbf16>
    %259 = vector.shape_cast %258 : vector<1x32x32xbf16> to vector<32x32xbf16>
    %cst_88 = arith.constant dense<0.000000e+00> : vector<8x32xf32>
    %260 = tpu.matmul %257, %259, %cst_88 {dimension_numbers = #tpu.dot_dimension_numbers<[1], [0], [0], [1], [0, 0, 1, 1], [], []>} : vector<8x32xbf16>, vector<32x32xbf16>, vector<8x32xf32> -> vector<8x32xf32>
    %c1_89 = arith.constant 1 : index
    %c0_90 = arith.constant 0 : index
    %c0_91 = arith.constant 0 : index
    %261 = vector.load %arg8[%c1_89, %c0_90, %c0_91] : memref<2x1x32xf32, #tpu.memory_space<vmem>>, vector<1x1x32xf32>
    %262 = vector.shape_cast %261 : vector<1x1x32xf32> to vector<1x32xf32>
    %263 = vector.broadcast %262 : vector<1x32xf32> to vector<8x32xf32>
    %264 = arith.addf %260, %263 : vector<8x32xf32>
    %265 = arith.addf %162, %264 : vector<8x32xf32>
    %c1_92 = arith.constant 1 : index
    %c0_93 = arith.constant 0 : index
    %c0_94 = arith.constant 0 : index
    %266 = vector.load %arg9[%c1_92, %c0_93, %c0_94] : memref<2x1x32xf32, #tpu.memory_space<vmem>>, vector<1x1x32xf32>
    %267 = vector.shape_cast %266 : vector<1x1x32xf32> to vector<1x32xf32>
    %c1_95 = arith.constant 1 : index
    %c0_96 = arith.constant 0 : index
    %c0_97 = arith.constant 0 : index
    %268 = vector.load %arg10[%c1_95, %c0_96, %c0_97] : memref<2x1x32xf32, #tpu.memory_space<vmem>>, vector<1x1x32xf32>
    %269 = vector.shape_cast %268 : vector<1x1x32xf32> to vector<1x32xf32>
    %cst_98 = arith.constant dense<0.000000e+00> : vector<8xf32>
    %270 = vector.multi_reduction <add>, %265, %cst_98 [1] : vector<8x32xf32> to vector<8xf32>
    %271 = vector.shape_cast %270 : vector<8xf32> to vector<8x1xf32>
    %cst_99 = arith.constant 3.200000e+01 : f32
    %272 = vector.broadcast %cst_99 : f32 to vector<8x1xf32>
    %273 = arith.divf %271, %272 : vector<8x1xf32>
    %274 = vector.broadcast %273 : vector<8x1xf32> to vector<8x32xf32>
    %275 = arith.subf %265, %274 : vector<8x32xf32>
    %276 = arith.mulf %275, %275 : vector<8x32xf32>
    %cst_100 = arith.constant dense<0.000000e+00> : vector<8xf32>
    %277 = vector.multi_reduction <add>, %276, %cst_100 [1] : vector<8x32xf32> to vector<8xf32>
    %278 = vector.shape_cast %277 : vector<8xf32> to vector<8x1xf32>
    %cst_101 = arith.constant 3.200000e+01 : f32
    %279 = vector.broadcast %cst_101 : f32 to vector<8x1xf32>
    %280 = arith.divf %278, %279 : vector<8x1xf32>
    %281 = vector.broadcast %273 : vector<8x1xf32> to vector<8x32xf32>
    %282 = arith.subf %265, %281 : vector<8x32xf32>
    %cst_102 = arith.constant 9.99999974E-6 : f32
    %283 = vector.broadcast %cst_102 : f32 to vector<8x1xf32>
    %284 = arith.addf %280, %283 : vector<8x1xf32>
    %285 = math.rsqrt %284 : vector<8x1xf32>
    %286 = vector.broadcast %285 : vector<8x1xf32> to vector<8x32xf32>
    %287 = arith.mulf %282, %286 : vector<8x32xf32>
    %288 = vector.broadcast %267 : vector<1x32xf32> to vector<8x32xf32>
    %289 = arith.mulf %287, %288 : vector<8x32xf32>
    %290 = vector.broadcast %269 : vector<1x32xf32> to vector<8x32xf32>
    %291 = arith.addf %289, %290 : vector<8x32xf32>
    %292 = arith.truncf %291 : vector<8x32xf32> to vector<8x32xbf16>
    %c1_103 = arith.constant 1 : index
    %c0_104 = arith.constant 0 : index
    %c0_105 = arith.constant 0 : index
    %293 = vector.load %arg11[%c1_103, %c0_104, %c0_105] : memref<2x32x64xbf16, #tpu.memory_space<vmem>>, vector<1x32x64xbf16>
    %294 = vector.shape_cast %293 : vector<1x32x64xbf16> to vector<32x64xbf16>
    %cst_106 = arith.constant dense<0.000000e+00> : vector<8x64xf32>
    %295 = tpu.matmul %292, %294, %cst_106 {dimension_numbers = #tpu.dot_dimension_numbers<[1], [0], [0], [1], [0, 0, 1, 1], [], []>} : vector<8x32xbf16>, vector<32x64xbf16>, vector<8x64xf32> -> vector<8x64xf32>
    %c1_107 = arith.constant 1 : index
    %c0_108 = arith.constant 0 : index
    %c0_109 = arith.constant 0 : index
    %296 = vector.load %arg12[%c1_107, %c0_108, %c0_109] : memref<2x1x64xf32, #tpu.memory_space<vmem>>, vector<1x1x64xf32>
    %297 = vector.shape_cast %296 : vector<1x1x64xf32> to vector<1x64xf32>
    %298 = vector.broadcast %297 : vector<1x64xf32> to vector<8x64xf32>
    %299 = arith.addf %295, %298 : vector<8x64xf32>
    %cst_110 = arith.constant 5.000000e-01 : f32
    %300 = vector.broadcast %cst_110 : f32 to vector<8x64xf32>
    %301 = arith.mulf %300, %299 : vector<8x64xf32>
    %cst_111 = arith.constant 4.471500e-02 : f32
    %302 = vector.broadcast %cst_111 : f32 to vector<8x64xf32>
    %303 = arith.mulf %302, %299 : vector<8x64xf32>
    %304 = arith.mulf %303, %299 : vector<8x64xf32>
    %305 = arith.mulf %304, %299 : vector<8x64xf32>
    %306 = arith.addf %299, %305 : vector<8x64xf32>
    %cst_112 = arith.constant 0.797884583 : f32
    %307 = vector.broadcast %cst_112 : f32 to vector<8x64xf32>
    %308 = arith.mulf %307, %306 : vector<8x64xf32>
    %309 = math.tanh %308 : vector<8x64xf32>
    %cst_113 = arith.constant 1.000000e+00 : f32
    %310 = vector.broadcast %cst_113 : f32 to vector<8x64xf32>
    %311 = arith.addf %310, %309 : vector<8x64xf32>
    %312 = arith.mulf %301, %311 : vector<8x64xf32>
    %313 = arith.truncf %312 : vector<8x64xf32> to vector<8x64xbf16>
    %c1_114 = arith.constant 1 : index
    %c0_115 = arith.constant 0 : index
    %c0_116 = arith.constant 0 : index
    %314 = vector.load %arg13[%c1_114, %c0_115, %c0_116] : memref<2x64x32xbf16, #tpu.memory_space<vmem>>, vector<1x64x32xbf16>
    %315 = vector.shape_cast %314 : vector<1x64x32xbf16> to vector<64x32xbf16>
    %cst_117 = arith.constant dense<0.000000e+00> : vector<8x32xf32>
    %316 = tpu.matmul %313, %315, %cst_117 {dimension_numbers = #tpu.dot_dimension_numbers<[1], [0], [0], [1], [0, 0, 1, 1], [], []>} : vector<8x64xbf16>, vector<64x32xbf16>, vector<8x32xf32> -> vector<8x32xf32>
    %c1_118 = arith.constant 1 : index
    %c0_119 = arith.constant 0 : index
    %c0_120 = arith.constant 0 : index
    %317 = vector.load %arg14[%c1_118, %c0_119, %c0_120] : memref<2x1x32xf32, #tpu.memory_space<vmem>>, vector<1x1x32xf32>
    %318 = vector.shape_cast %317 : vector<1x1x32xf32> to vector<1x32xf32>
    %319 = vector.broadcast %318 : vector<1x32xf32> to vector<8x32xf32>
    %320 = arith.addf %316, %319 : vector<8x32xf32>
    %321 = arith.addf %265, %320 : vector<8x32xf32>
    %c0_121 = arith.constant 0 : index
    %c0_122 = arith.constant 0 : index
    %322 = vector.load %arg15[%c0_121, %c0_122] : memref<1x32xf32, #tpu.memory_space<vmem>>, vector<1x32xf32>
    %c0_123 = arith.constant 0 : index
    %c0_124 = arith.constant 0 : index
    %323 = vector.load %arg16[%c0_123, %c0_124] : memref<1x32xf32, #tpu.memory_space<vmem>>, vector<1x32xf32>
    %cst_125 = arith.constant dense<0.000000e+00> : vector<8xf32>
    %324 = vector.multi_reduction <add>, %321, %cst_125 [1] : vector<8x32xf32> to vector<8xf32>
    %325 = vector.shape_cast %324 : vector<8xf32> to vector<8x1xf32>
    %cst_126 = arith.constant 3.200000e+01 : f32
    %326 = vector.broadcast %cst_126 : f32 to vector<8x1xf32>
    %327 = arith.divf %325, %326 : vector<8x1xf32>
    %328 = vector.broadcast %327 : vector<8x1xf32> to vector<8x32xf32>
    %329 = arith.subf %321, %328 : vector<8x32xf32>
    %330 = arith.mulf %329, %329 : vector<8x32xf32>
    %cst_127 = arith.constant dense<0.000000e+00> : vector<8xf32>
    %331 = vector.multi_reduction <add>, %330, %cst_127 [1] : vector<8x32xf32> to vector<8xf32>
    %332 = vector.shape_cast %331 : vector<8xf32> to vector<8x1xf32>
    %cst_128 = arith.constant 3.200000e+01 : f32
    %333 = vector.broadcast %cst_128 : f32 to vector<8x1xf32>
    %334 = arith.divf %332, %333 : vector<8x1xf32>
    %335 = vector.broadcast %327 : vector<8x1xf32> to vector<8x32xf32>
    %336 = arith.subf %321, %335 : vector<8x32xf32>
    %cst_129 = arith.constant 9.99999974E-6 : f32
    %337 = vector.broadcast %cst_129 : f32 to vector<8x1xf32>
    %338 = arith.addf %334, %337 : vector<8x1xf32>
    %339 = math.rsqrt %338 : vector<8x1xf32>
    %340 = vector.broadcast %339 : vector<8x1xf32> to vector<8x32xf32>
    %341 = arith.mulf %336, %340 : vector<8x32xf32>
    %342 = vector.broadcast %322 : vector<1x32xf32> to vector<8x32xf32>
    %343 = arith.mulf %341, %342 : vector<8x32xf32>
    %344 = vector.broadcast %323 : vector<1x32xf32> to vector<8x32xf32>
    %345 = arith.addf %343, %344 : vector<8x32xf32>
    %346 = arith.truncf %345 : vector<8x32xf32> to vector<8x32xbf16>
    %c0_130 = arith.constant 0 : index
    %c0_131 = arith.constant 0 : index
    %347 = vector.load %arg17[%c0_130, %c0_131] : memref<32x128xbf16, #tpu.memory_space<vmem>>, vector<32x128xbf16>
    %cst_132 = arith.constant dense<0.000000e+00> : vector<8x128xf32>
    %348 = tpu.matmul %346, %347, %cst_132 {dimension_numbers = #tpu.dot_dimension_numbers<[1], [0], [0], [1], [0, 0, 1, 1], [], []>} : vector<8x32xbf16>, vector<32x128xbf16>, vector<8x128xf32> -> vector<8x128xf32>
    %c0_133 = arith.constant 0 : index
    %c0_134 = arith.constant 0 : index
    %349 = vector.load %arg18[%c0_133, %c0_134] : memref<1x128xf32, #tpu.memory_space<vmem>>, vector<1x128xf32>
    %350 = vector.broadcast %349 : vector<1x128xf32> to vector<8x128xf32>
    %351 = arith.addf %348, %350 : vector<8x128xf32>
    %c0_135 = arith.constant 0 : index
    %c0_136 = arith.constant 0 : index
    %c0_137 = arith.constant 0 : index
    %352 = vector.load %arg19[%c0_135, %c0_136, %c0_137] : memref<1x8x128xf32, #tpu.memory_space<vmem>>, vector<1x8x128xf32>
    %353 = vector.shape_cast %352 : vector<1x8x128xf32> to vector<8x128xf32>
    %354 = vector.shape_cast %351 : vector<8x128xf32> to vector<1x8x128xf32>
    tpu.vector_store %arg19[%c0_135, %c0_136, %c0_137], %354 {strides = array<i32>} : memref<1x8x128xf32, #tpu.memory_space<vmem>>, vector<1x8x128xf32>,
    return
  }
  func.func @transform_0(%arg0: i32) -> (i32, i32, i32) {
    %c0_i32 = arith.constant 0 : i32
    %c0_i32_0 = arith.constant 0 : i32
    %c0_i32_1 = arith.constant 0 : i32
    return %arg0, %c0_i32, %c0_i32_0 : i32, i32, i32
  }
  func.func @transform_1(%arg0: i32) -> (i32, i32, i32) {
    %c0_i32 = arith.constant 0 : i32
    %c0_i32_0 = arith.constant 0 : i32
    %c0_i32_1 = arith.constant 0 : i32
    return %arg0, %c0_i32, %c0_i32_0 : i32, i32, i32
  }
  func.func @transform_2(%arg0: i32) -> (i32, i32, i32) {
    %c0_i32 = arith.constant 0 : i32
    %c0_i32_0 = arith.constant 0 : i32
    %c0_i32_1 = arith.constant 0 : i32
    %c0_i32_2 = arith.constant 0 : i32
    return %c0_i32, %c0_i32_0, %c0_i32_1 : i32, i32, i32
  }
  func.func @transform_3(%arg0: i32) -> (i32, i32, i32) {
    %c0_i32 = arith.constant 0 : i32
    %c0_i32_0 = arith.constant 0 : i32
    %c0_i32_1 = arith.constant 0 : i32
    %c0_i32_2 = arith.constant 0 : i32
    return %c0_i32, %c0_i32_0, %c0_i32_1 : i32, i32, i32
  }
  func.func @transform_4(%arg0: i32) -> (i32, i32, i32) {
    %c0_i32 = arith.constant 0 : i32
    %c0_i32_0 = arith.constant 0 : i32
    %c0_i32_1 = arith.constant 0 : i32
    %c0_i32_2 = arith.constant 0 : i32
    return %c0_i32, %c0_i32_0, %c0_i32_1 : i32, i32, i32
  }
  func.func @transform_5(%arg0: i32) -> (i32, i32, i32) {
    %c0_i32 = arith.constant 0 : i32
    %c0_i32_0 = arith.constant 0 : i32
    %c0_i32_1 = arith.constant 0 : i32
    %c0_i32_2 = arith.constant 0 : i32
    return %c0_i32, %c0_i32_0, %c0_i32_1 : i32, i32, i32
  }
  func.func @transform_6(%arg0: i32) -> (i32, i32, i32) {
    %c0_i32 = arith.constant 0 : i32
    %c0_i32_0 = arith.constant 0 : i32
    %c0_i32_1 = arith.constant 0 : i32
    %c0_i32_2 = arith.constant 0 : i32
    return %c0_i32, %c0_i32_0, %c0_i32_1 : i32, i32, i32
  }
  func.func @transform_7(%arg0: i32) -> (i32, i32, i32) {
    %c0_i32 = arith.constant 0 : i32
    %c0_i32_0 = arith.constant 0 : i32
    %c0_i32_1 = arith.constant 0 : i32
    %c0_i32_2 = arith.constant 0 : i32
    return %c0_i32, %c0_i32_0, %c0_i32_1 : i32, i32, i32
  }
  func.func @transform_8(%arg0: i32) -> (i32, i32, i32) {
    %c0_i32 = arith.constant 0 : i32
    %c0_i32_0 = arith.constant 0 : i32
    %c0_i32_1 = arith.constant 0 : i32
    %c0_i32_2 = arith.constant 0 : i32
    return %c0_i32, %c0_i32_0, %c0_i32_1 : i32, i32, i32
  }
  func.func @transform_9(%arg0: i32) -> (i32, i32, i32) {
    %c0_i32 = arith.constant 0 : i32
    %c0_i32_0 = arith.constant 0 : i32
    %c0_i32_1 = arith.constant 0 : i32
    %c0_i32_2 = arith.constant 0 : i32
    return %c0_i32, %c0_i32_0, %c0_i32_1 : i32, i32, i32
  }
  func.func @transform_10(%arg0: i32) -> (i32, i32, i32) {
    %c0_i32 = arith.constant 0 : i32
    %c0_i32_0 = arith.constant 0 : i32
    %c0_i32_1 = arith.constant 0 : i32
    %c0_i32_2 = arith.constant 0 : i32
    return %c0_i32, %c0_i32_0, %c0_i32_1 : i32, i32, i32
  }
  func.func @transform_11(%arg0: i32) -> (i32, i32, i32) {
    %c0_i32 = arith.constant 0 : i32
    %c0_i32_0 = arith.constant 0 : i32
    %c0_i32_1 = arith.constant 0 : i32
    %c0_i32_2 = arith.constant 0 : i32
    return %c0_i32, %c0_i32_0, %c0_i32_1 : i32, i32, i32
  }
  func.func @transform_12(%arg0: i32) -> (i32, i32, i32) {
    %c0_i32 = arith.constant 0 : i32
    %c0_i32_0 = arith.constant 0 : i32
    %c0_i32_1 = arith.constant 0 : i32
    %c0_i32_2 = arith.constant 0 : i32
    return %c0_i32, %c0_i32_0, %c0_i32_1 : i32, i32, i32
  }
  func.func @transform_13(%arg0: i32) -> (i32, i32, i32) {
    %c0_i32 = arith.constant 0 : i32
    %c0_i32_0 = arith.constant 0 : i32
    %c0_i32_1 = arith.constant 0 : i32
    %c0_i32_2 = arith.constant 0 : i32
    return %c0_i32, %c0_i32_0, %c0_i32_1 : i32, i32, i32
  }
  func.func @transform_14(%arg0: i32) -> (i32, i32) {
    %c0_i32 = arith.constant 0 : i32
    %c0_i32_0 = arith.constant 0 : i32
    %c0_i32_1 = arith.constant 0 : i32
    return %c0_i32, %c0_i32_0 : i32, i32
  }
  func.func @transform_15(%arg0: i32) -> (i32, i32) {
    %c0_i32 = arith.constant 0 : i32
    %c0_i32_0 = arith.constant 0 : i32
    %c0_i32_1 = arith.constant 0 : i32
    return %c0_i32, %c0_i32_0 : i32, i32
  }
  func.func @transform_16(%arg0: i32) -> (i32, i32) {
    %c0_i32 = arith.constant 0 : i32
    %c0_i32_0 = arith.constant 0 : i32
    %c0_i32_1 = arith.constant 0 : i32
    return %c0_i32, %c0_i32_0 : i32, i32
  }
  func.func @transform_17(%arg0: i32) -> (i32, i32) {
    %c0_i32 = arith.constant 0 : i32
    %c0_i32_0 = arith.constant 0 : i32
    %c0_i32_1 = arith.constant 0 : i32
    return %c0_i32, %c0_i32_0 : i32, i32
  }
  func.func @transform_18(%arg0: i32) -> (i32, i32, i32) {
    %c0_i32 = arith.constant 0 : i32
    %c0_i32_0 = arith.constant 0 : i32
    %c0_i32_1 = arith.constant 0 : i32
    return %arg0, %c0_i32, %c0_i32_0 : i32, i32, i32
  }
}

</mosaic_0001>

<bundles_post_ra>
// kernel: encoder_forward.1
= control target key start
LH: loop header
LB: loop body
LE: loop exit
PB: predicated region body
PF: predicated region fallthrough
CT: control target
= control target key end

     0   :  { %s3564_s0 = inlined_call_operand.vmem [shape: f32[2,8,32], index: 0, kind: input, shape index: {}]   ;;  %s3565_s1 = inlined_call_operand.vmem [shape: f32[2,1,8], index: 1, kind: input, shape index: {}]   ;;  %s3566_s2 = inlined_call_operand.vmem [shape: f32[2,1,32], index: 2, kind: input, shape index: {}]   ;;  %s3567_s3 = inlined_call_operand.vmem [shape: f32[2,1,32], index: 3, kind: input, shape index: {}]   ;;  %s3568_s4 = inlined_call_operand.vmem [shape: bf16[2,32,96], index: 4, kind: input, shape index: {}]   ;;  %s3569_s5 = inlined_call_operand.vmem [shape: f32[2,1,96], index: 5, kind: input, shape index: {}]   ;;  %s3570_s6 = inlined_call_operand.vmem [shape: bf16[2,32,32], index: 6, kind: input, shape index: {}]   ;;  %s3571_s7 = inlined_call_operand.vmem [shape: f32[2,1,32], index: 7, kind: input, shape index: {}]   ;;  %s3572_s8 = inlined_call_operand.vmem [shape: f32[2,1,32], index: 8, kind: input, shape index: {}]   ;;  %s3573_s9 = inlined_call_operand.vmem [shape: f32[2,1,32], index: 9, kind: input, shape index: {}]   ;;  %s3574_s10 = inlined_call_operand.vmem [shape: bf16[2,32,64], index: 10, kind: input, shape index: {}]   ;;  %s3575_s11 = inlined_call_operand.vmem [shape: f32[2,1,64], index: 11, kind: input, shape index: {}]   ;;  %s3576_s12 = inlined_call_operand.vmem [shape: bf16[2,64,32], index: 12, kind: input, shape index: {}]   ;;  %s3577_s13 = inlined_call_operand.vmem [shape: f32[2,1,32], index: 13, kind: input, shape index: {}]   ;;  %s3578_s14 = inlined_call_operand.vmem [shape: f32[1,32], index: 14, kind: input, shape index: {}]   ;;  %s3579_s15 = inlined_call_operand.vmem [shape: f32[1,32], index: 15, kind: input, shape index: {}]   ;;  %s3580_s16 = inlined_call_operand.vmem [shape: bf16[32,128], index: 16, kind: input, shape index: {}]   ;;  %s3581_s17 = inlined_call_operand.vmem [shape: f32[1,128], index: 17, kind: input, shape index: {}]   ;;  %s3582_s18 = inlined_call_operand.hbm [shape: f32[2,8,128], index: 18, kind: output, shape index: {}]  }
   0x1   :  { %3597 = sst [smem:[#allocation8_spill]] %s3564_s0 }
   0x2   :  { %3598 = sst [smem:[#allocation9_spill]] %s3565_s1 }
   0x3   :  { %3599 = sst [smem:[#allocation10_spill]] %s3566_s2 }
   0x4   :  { %3600 = sst [smem:[#allocation11_spill]] %s3567_s3 }
   0x5   :  { %3601 = sst [smem:[#allocation12_spill]] %s3568_s4 }
   0x6   :  { %23 = vsyncpa [#allocation3], 0 }
   0x7   :  { %25 = vsyncpa [#allocation3 + $0x1], 0  ;;  %s3075_s27 = smov 0   ;;  %s3077_s28 = smov 0  }
   0x8   :  { %s3079_s29 = smov 0   ;;  %s3081_s30 = smov 0  }
   0x9 LB: > { %3602 = sst [smem:[#allocation5_spill]] %s2963_s29  ;;  %s3096_s0 = sadd.s32 4294967295, %s2967_s30   ;;  %s2967_s30 = sphi %s3081_s30, %s3620_s30   ;;  %s2963_s29 = sphi %s3079_s29, %s3622_s29   ;;  %s2959_s28 = sphi %s3077_s28, %s3624_s28   ;;  %s2955_s27 = sphi %s3075_s27, %s3623_s27  }
   0xa   : > { %s2444_s19 = sadd.s32 4294967294, %s2967_s30   ;;  %s3100_s1 = sadd.s32 1, %s2967_s30  }
   0xb   : > { %3603 = sst [smem:[#allocation6_spill]] %s3100_s1  ;;  %s426_s20 = sadd.s32 1, %s2963_s29 }
   0xc   : > { %s423_s21 = ssub.s32 %s2967_s30, %s3100_s1  ;;  %p436_p0 = scmp.ne.s32.totalorder %s2963_s29, %s2959_s28 }
   0xd   : > { %p424_p1 = scmp.eq.s32.totalorder %s423_s21, 0  ;;  %p437_p2 = scmp.eq.s32.totalorder %s3096_s0, 1 }
   0xe   : > { %p442_p3 = scmp.ne.s32.totalorder %s2959_s28, %s2955_s27  ;;  %p443_p4 = scmp.eq.s32.totalorder %s2444_s19, 1 }
   0xf   : > { %s3111_s22 = scalar_select %p424_p1, %s2963_s29, %s426_s20  }
  0x10   : > { %p3113_p5 = por %p437_p2, %p436_p0  ;;  %p3117_p6 = por %p443_p4, %p442_p3 }
  0x11   : > { %3604 = sst [smem:[#allocation7_spill]] %s3111_s22  ;;  %p2447_p7 = scmp.ge.s32.totalorder %s2967_s30, 1 }
  0x12   : > { %p522_p8 = scmp.lt.s32.totalorder %s2967_s30, 3 }
  0x14   : > { %p523_p9 = pnand %p2447_p7, %p522_p8 }
  0x15   : > { %p578_p10 = scmp.lt.s32.totalorder (!%p523_p9), %s3096_s0, 1  ;;  %vm590_vm0 = vcmask (!%p523_p9), 261120   ;;  %s3607_s20 = sld [smem:[#allocation8_spill]] (!%p523_p9)  ;;  %v2969_v8 = vmov (!%p523_p9), 0.0   ;;  %vm2970_vm1 = vmmov (!%p523_p9), 0   ;;  %vm703_vm2 = vcmask (!%p523_p9), 64512  }
  0x16   : > { %526 = sbr.rel (%p523_p9) target bundleno = 5833 (0x16c9), region = 92  ;;  %s3608_s4 = sld [smem:[#allocation12_spill]] (!%p523_p9)  ;;  %2612 = vmatprep.subr.bf16.mxu0 (!%p523_p9), %v2969_v8  ;;  %2616 = vmatprep.mubr.msk.bf16.mxu0 (!%p523_p9), %vm2970_vm1, %v2969_v8  ;;  %v2452_v20 = vld [vmem:[%s3569_s5] ss:$0 sm:$0xff] (!%p523_p9)  ;;  %vm964_vm3 = vcmask (!%p523_p9), 1043456   ;;  %vm1165_vm4 = vcmask (!%p523_p9), 130048  }
  0x17   : > { %2620 = vmatprep.subr.bf16.mxu1 (!%p523_p9), %v2969_v8  ;;  %2622 = vmatprep.mubr.msk.bf16.mxu1 (!%p523_p9), %vm2970_vm1, %v2969_v8  ;;  %s3609_s19 = sld [smem:[#allocation10_spill]] (!%p523_p9)  ;;  %s3610_s3 = sld [smem:[#allocation11_spill]] (!%p523_p9)  ;;  %vm1167_vm5 = vcmask (!%p523_p9), 195584   ;;  %vm1382_vm6 = vcmask (!%p523_p9), 523264  }
  0x18   : > { %s3587_s29 = smov (!%p523_p9), 104   ;;  %s3593_s22 = smov (!%p523_p9), 120  }
  0x19   : > { %s3613_s26 = smov (!%p523_p9), 120   ;;  %s3616_s1 = smov (!%p523_p9), 64  }
  0x1c   : > { %v2837_v7 = vld [vmem:[%s3608_s4] sm:$0xff] (!%p523_p9)   ;;  %v2838_v9 = vld [vmem:[%s3608_s4 + $0x8] sm:$0xff] (!%p523_p9)  }
  0x1d   : > { %s3125_s24 = scalar_select %p578_p10, %s3096_s0, 1  ;;  %2613 = vmatpush3.bf16.msra.mxu0 %v2837_v7  ;;  %v2450_v14 = vld [vmem:[%s3609_s19] ss:$0 sm:$0xff] }
  0x1e   : > { %2614 = vmatprep.subr.bf16.mxu0 %v2969_v8  ;;  %v2451_v16 = vld [vmem:[%s3610_s3] ss:$0 sm:$0xff] }
  0x1f   : > { %s2449_s25 = sshll.u32 %s3125_s24, 3 }
  0x20   : > { %s581_s21 = scalar_lea.vmem %s3607_s20, %s2449_s25  ;;  %s3594_s20 = smov 112  }
  0x21   : > { %v3131_v0 = vld [vmem:[%s581_s21] sm:$0xff]  ;;  %2615 = vmatpush3.bf16.msra.mxu0 %v2838_v9  ;;  %s3585_s21 = smov 96   ;;  %s3612_s25 = smov 112  }
  0x22   : > { %v591_v1 = vsel %vm590_vm0, %v3131_v0, 0.0  ;;  %2626 = vmatprep.subr.bf16.mxu0 %v2969_v8 }
  0x23   : > { %592 = vadd.xlane.f32.xlu0 %v591_v1 }
  0xb0   : > { %v593_v2 = vpop.xlane.xlu0 %592 }
  0xb1   : > { %v595_v3 = vmul.f32 0.03125, %v593_v2 }
  0xb3   : > { %v596_v4 = vsub.f32 %v3131_v0, %v595_v3 }
  0xb5   : > { %v597_v5 = vmul.f32 %v596_v4, %v596_v4 }
  0xb7   : > { %v598_v6 = vsel %vm590_vm0, %v597_v5, 0.0 }
  0xb8   : > { %599 = vadd.xlane.f32.xlu0 %v598_v6 }
 0x145   : > { %v600_v10 = vpop.xlane.xlu0 %599 }
 0x146   : > { %v601_v11 = vmul.f32 0.03125, %v600_v10 }
 0x148   : > { %v602_v12 = vadd.f32 1e-05, %v601_v11 }
 0x14a   : > { %2859 = vrsqrt.f32 %v602_v12 }
 0x154   : > { %v2860_v13 = vpop.eup %2859 }
 0x155   : > { %v604_v15 = vmul.f32 %v2860_v13, %v596_v4 }
 0x157   : > { %v611_v17 = vmul.f32 %v2450_v14, %v604_v15 }
 0x159   : > { %v618_v18 = vadd.f32 %v2451_v16, %v611_v17 }
 0x15b   : > { %v619_v19 = vpack.c.bf16 %v618_v18, %v618_v18 }
 0x15d   : > { %2617 = vmatmul.mubr.msk.bf16.vlgmr.msra.gmra.mrb[0].mxu0 %vm590_vm0, %v619_v19 }
 0x15e   : > { %2628 = vmatprep.mubr.msk.bf16.mxu0 %vm2970_vm1, %v2969_v8 }
 0x230   : > { %v680_v21 = vpop.f32.mrb[0].mxu0 }
 0x231   : > { %v681_v22 = vadd.f32 %v2452_v20, %v680_v21  ;;  %v2618_v23 = vpop.f32.mrb[1].mxu0 }
 0x232   : > { %v683_v24 = vpop.f32.mrb[2].mxu0 }
 0x233   : > { %693 = vrot.lane.b32.xlu0 %v681_v22, %s3587_s29  ;;  %687 = vrot.lane.b32.xlu1 %v681_v22, %s3593_s22  ;;  %v2619_v25 = vpop.f32.mrb[3].mxu0  ;;  %v3166_v26 = vpack.c.bf16 %v681_v22, %v681_v22 }
 0x237   : > { %690 = vrot.lane.b32.xlu1 %v681_v22, %s3594_s20 }
 0x23b   : > { %701 = vrot.lane.b32.xlu1 %v3166_v26, %s3585_s21 }
 0x2a5   : > { %v688_v27 = vpop.permute.xlu1 %687  ;;  %v694_v31 = vpop.permute.xlu0 %693 }
 0x2a6   : > { %v3170_v28 = vpack.c.bf16 %v688_v27, %v688_v27  ;;  %v3178_v33 = vpack.c.bf16 %v694_v31, %v694_v31 }
 0x2a8   : > { %751 = vrot.lane.b32.xlu1 %v3170_v28, %s3585_s21 }
 0x2a9   : > { %v691_v29 = vpop.permute.xlu1 %690 }
 0x2aa   : > { %v3174_v30 = vpack.c.bf16 %v691_v29, %v691_v29 }
 0x2ac   : > { %800 = vrot.lane.b32.xlu1 %v3174_v30, %s3585_s21 }
 0x2ad   : > { %v702_v32 = vpop.permute.xlu1 %701 }
 0x2ae   : > { %v708_v34 = vsel %vm703_vm2, %v702_v32, 0 }
 0x2af   : > { %2621 = vmatpush3.bf16.xpose.msra.mxu1 %v708_v34 }
 0x2b0   : > { %849 = vrot.lane.b32.xlu1 %v3178_v33, %s3585_s21  ;;  %2632 = vmatprep.subr.bf16.mxu1 %v2969_v8  ;;  %s3611_s21 = sld [smem:[#allocation9_spill]] }
 0x2b6   : > { %2623 = vmatmul.mubr.msk.bf16.vlgmr.msra.gmra.mrb[0].mxu1 %vm703_vm2, %v3166_v26  ;;  %s584_s29 = scalar_lea.vmem %s3611_s21, %s3125_s24  ;;  %s3588_s24 = smov 64  }
 0x2b7   : > { %2634 = vmatprep.mubr.msk.bf16.mxu1 %vm2970_vm1, %v2969_v8  ;;  %v3210_v41 = vld [vmem:[%s584_s29] ss:$0 sm:$0xff]  ;;  %s3592_s29 = smov 16   ;;  %s3590_s21 = smov 24  }
 0x31a   : > { %v752_v35 = vpop.permute.xlu1 %751 }
 0x31b   : > { %v757_v36 = vsel %vm703_vm2, %v752_v35, 0 }
 0x31c   : > { %2627 = vmatpush3.bf16.xpose.msra.mxu0 %v757_v36 }
 0x31d   : > { %2638 = vmatprep.subr.bf16.mxu0 %v2969_v8 }
 0x31e   : > { %v801_v37 = vpop.permute.xlu1 %800 }
 0x31f   : > { %v806_v38 = vsel %vm703_vm2, %v801_v37, 0 }
 0x320   : > { %2633 = vmatpush3.bf16.xpose.msra.mxu1 %v806_v38 }
 0x321   : > { %2644 = vmatprep.subr.bf16.mxu1 %v2969_v8 }
 0x322   : > { %v850_v39 = vpop.permute.xlu1 %849 }
 0x323   : > { %v855_v40 = vsel %vm703_vm2, %v850_v39, 0  ;;  %2629 = vmatmul.mubr.msk.bf16.vlgmr.msra.gmra.mrb[4].mxu0 %vm703_vm2, %v3170_v28 }
 0x324   : > { %2639 = vmatpush3.bf16.xpose.msra.mxu0 %v855_v40  ;;  %2640 = vmatprep.mubr.msk.bf16.mxu0 %vm2970_vm1, %v2969_v8 }
 0x325   : > { %2650 = vmatprep.subr.bf16.mxu0 %v2969_v8 }
 0x327   : > { %2635 = vmatmul.mubr.msk.bf16.vlgmr.msra.gmra.mrb[4].mxu1 %vm703_vm2, %v3174_v30 }
 0x328   : > { %2646 = vmatprep.mubr.msk.bf16.mxu1 %vm2970_vm1, %v2969_v8 }
 0x32b   : > { %2641 = vmatmul.mubr.msk.bf16.vlgmr.msra.gmra.mrb[8].mxu0 %vm703_vm2, %v3178_v33 }
 0x32c   : > { %2652 = vmatprep.mubr.msk.bf16.mxu0 %vm2970_vm1, %v2969_v8 }
 0x389   : > { %v744_v42 = vpop.f32.mrb[0].mxu1 }
 0x38a   : > { %v897_v43 = vmul.f32 0.35355338, %v744_v42  ;;  %v2624_v44 = vpop.f32.mrb[1].mxu1 }
 0x38b   : > { %v747_v45 = vpop.f32.mrb[2].mxu1 }
 0x38c   : > { %v2625_v46 = vpop.f32.mrb[3].mxu1  ;;  %v907_v47 = vadd.f32 %v3210_v41, %v897_v43 }
 0x38e   : > { %v911_v48 = vsel %vm703_vm2, %v907_v47, -inf }
 0x38f   : > { %912 = vmax.xlane.f32.xlu1 %v911_v48 }
 0x3f6   : > { %v793_v49 = vpop.f32.mrb[4].mxu0 }
 0x3f7   : > { %v898_v50 = vmul.f32 0.35355338, %v793_v49  ;;  %v2630_v51 = vpop.f32.mrb[5].mxu0 }
 0x3f8   : > { %v796_v52 = vpop.f32.mrb[6].mxu0 }
 0x3f9   : > { %v2631_v53 = vpop.f32.mrb[7].mxu0  ;;  %v908_v54 = vadd.f32 %v3210_v41, %v898_v50 }
 0x3fa   : > { %v842_v55 = vpop.f32.mrb[4].mxu1 }
 0x3fb   : > { %v899_v56 = vmul.f32 0.35355338, %v842_v55  ;;  %v2636_v57 = vpop.f32.mrb[5].mxu1  ;;  %v914_v58 = vsel %vm703_vm2, %v908_v54, -inf }
 0x3fc   : > { %v845_v59 = vpop.f32.mrb[6].mxu1  ;;  %915 = vmax.xlane.f32.xlu0 %v914_v58  ;;  %v2839_v57 = vld [vmem:[%s3570_s6] sm:$0xff]   ;;  %v2840_v58 = vld [vmem:[%s3570_s6 + $0x8] sm:$0xff]  }
 0x3fd   : > { %v2637_v60 = vpop.f32.mrb[7].mxu1  ;;  %v909_v61 = vadd.f32 %v3210_v41, %v899_v56 }
 0x3fe   : > { %v891_v62 = vpop.f32.mrb[8].mxu0 }
 0x3ff   : > { %v900_v63 = vmul.f32 0.35355338, %v891_v62  ;;  %v2642_v1 = vpop.f32.mrb[9].mxu0  ;;  %v917_v2 = vsel %vm703_vm2, %v909_v61, -inf }
 0x400   : > { %918 = vmax.xlane.f32.xlu1 %v917_v2  ;;  %v894_v3 = vpop.f32.mrb[10].mxu0 }
 0x401   : > { %v2643_v4 = vpop.f32.mrb[11].mxu0  ;;  %v910_v5 = vadd.f32 %v3210_v41, %v900_v63 }
 0x403   : > { %v920_v6 = vsel %vm703_vm2, %v910_v5, -inf }
 0x404   : > { %921 = vmax.xlane.f32.xlu0 %v920_v6 }
 0x411   : > { %959 = vrot.lane.b32.xlu1 %v3166_v26, %s3588_s24 }
 0x41c   : > { %v913_v7 = vpop.xlane.xlu1 %912 }
 0x41d   : > { %v923_v9 = vsub.f32 %v907_v47, %v913_v7 }
 0x41f   : > { %v927_v10 = vmul.f32 1.442695, %v923_v9 }
 0x421   : > { %2861 = vpow2.f32 %v927_v10 }
 0x42b   : > { %v2862_v11 = vpop.eup %2861 }
 0x42c   : > { %v935_v12 = vsel %vm703_vm2, %v2862_v11, 0.0 }
 0x435   : > { %936 = vadd.xlane.f32.xlu1 %v935_v12 }
 0x489   : > { %v916_v13 = vpop.xlane.xlu0 %915 }
 0x48a   : > { %v924_v14 = vsub.f32 %v908_v54, %v916_v13 }
 0x48c   : > { %v929_v15 = vmul.f32 1.442695, %v924_v14 }
 0x48d   : > { %v919_v16 = vpop.xlane.xlu1 %918 }
 0x48e   : > { %2863 = vpow2.f32 %v929_v15  ;;  %v925_v17 = vsub.f32 %v909_v61, %v919_v16  ;;  %v2465_v16 = vld [vmem:[%s3571_s7] ss:$0 sm:$0xff] }
 0x490   : > { %v931_v18 = vmul.f32 1.442695, %v925_v17 }
 0x491   : > { %v960_v19 = vpop.permute.xlu1 %959  ;;  %v922_v20 = vpop.xlane.xlu0 %921 }
 0x492   : > { %2865 = vpow2.f32 %v931_v18  ;;  %v966_v21 = vsel %vm964_vm3, %v960_v19, 0  ;;  %v926_v22 = vsub.f32 %v910_v5, %v922_v20 }
 0x493   : > { %2645 = vmatpush3.bf16.msra.mxu1 %v966_v21 }
 0x494   : > { %v933_v23 = vmul.f32 1.442695, %v926_v22  ;;  %2656 = vmatprep.subr.bf16.mxu1 %v2969_v8 }
 0x496   : > { %2867 = vpow2.f32 %v933_v23 }
 0x498   : > { %v2864_v24 = vpop.eup %2863 }
 0x499   : > { %v938_v25 = vsel %vm703_vm2, %v2864_v24, 0.0 }
 0x49a   : > { %939 = vadd.xlane.f32.xlu0 %v938_v25 }
 0x49c   : > { %v2866_v26 = vpop.eup %2865 }
 0x49d   : > { %v941_v27 = vsel %vm703_vm2, %v2866_v26, 0.0 }
 0x49e   : > { %942 = vadd.xlane.f32.xlu1 %v941_v27 }
 0x4a0   : > { %v2868_v29 = vpop.eup %2867 }
 0x4a1   : > { %v944_v31 = vsel %vm703_vm2, %v2868_v29, 0.0 }
 0x4a2   : > { %945 = vadd.xlane.f32.xlu0 %v944_v31  ;;  %v2841_v31 = vld [vmem:[%s3574_s10] sm:$0xff]  }
 0x4af   : > { %1056 = vrot.lane.b32.xlu1 %v3174_v30, %s3588_s24 }
 0x4b3   : > { %1104 = vrot.lane.b32.xlu1 %v3178_v33, %s3588_s24 }
 0x4b8   : > { %1008 = vrot.lane.b32.xlu0 %v3170_v28, %s3588_s24  ;;  %s3591_s24 = smov 8  }
 0x4c2   : > { %v937_v32 = vpop.xlane.xlu1 %936 }
 0x4c3   : > { %2869 = vrcp.f32 %v937_v32 }
 0x4cd   : > { %v2870_v34 = vpop.eup %2869 }
 0x4ce   : > { %v951_v35 = vmul.f32 %v2870_v34, %v2862_v11 }
 0x4d0   : > { %v955_v36 = vpack.c.bf16 %v951_v35, %v951_v35 }
 0x4d2   : > { %2647 = vmatmul.mubr.msk.bf16.vlgmr.msra.gmra.mrb[8].mxu1 %vm703_vm2, %v955_v36 }
 0x4d3   : > { %2658 = vmatprep.mubr.msk.bf16.mxu1 %vm2970_vm1, %v2969_v8 }
 0x527   : > { %v940_v37 = vpop.xlane.xlu0 %939 }
 0x528   : > { %2871 = vrcp.f32 %v940_v37  ;;  %v2469_v37 = vld [vmem:[%s3572_s8] ss:$0 sm:$0xff] }
 0x52b   : > { %v943_v38 = vpop.xlane.xlu1 %942 }
 0x52c   : > { %2873 = vrcp.f32 %v943_v38 }
 0x52f   : > { %v1057_v30 = vpop.permute.xlu1 %1056  ;;  %v946_v39 = vpop.xlane.xlu0 %945 }
 0x530   : > { %v1062_v33 = vsel %vm964_vm3, %v1057_v30, 0  ;;  %2875 = vrcp.f32 %v946_v39  ;;  %v2470_v30 = vld [vmem:[%s3573_s9] ss:$0 sm:$0xff] }
 0x531   : > { %2657 = vmatpush3.bf16.msra.mxu1 %v1062_v33 }
 0x532   : > { %v2872_v28 = vpop.eup %2871  ;;  %2668 = vmatprep.subr.bf16.mxu1 %v2969_v8 }
 0x533   : > { %v952_v40 = vmul.f32 %v2872_v28, %v2864_v24  ;;  %v1009_v42 = vpop.permute.xlu0 %1008  ;;  %v1105_v44 = vpop.permute.xlu1 %1104 }
 0x534   : > { %v1014_v43 = vsel %vm964_vm3, %v1009_v42, 0  ;;  %v1110_v48 = vsel %vm964_vm3, %v1105_v44, 0  ;;  %v2844_v42 = vld [vmem:[%s3576_s12 + $0x8] sm:$0xff]   ;;  %v2846_v44 = vld [vmem:[%s3576_s12 + $0x18] sm:$0xff]  }
 0x535   : > { %2651 = vmatpush3.bf16.msra.mxu0 %v1014_v43  ;;  %v956_v45 = vpack.c.bf16 %v952_v40, %v952_v40  ;;  %v2843_v40 = vld [vmem:[%s3576_s12] sm:$0xff]   ;;  %v2845_v43 = vld [vmem:[%s3576_s12 + $0x10] sm:$0xff]  }
 0x536   : > { %v2874_v46 = vpop.eup %2873  ;;  %2662 = vmatprep.subr.bf16.mxu0 %v2969_v8 }
 0x537   : > { %v953_v47 = vmul.f32 %v2874_v46, %v2866_v26 }
 0x538   : > { %2653 = vmatmul.mubr.msk.bf16.vlgmr.msra.gmra.mrb[12].mxu0 %vm703_vm2, %v956_v45  ;;  %v2471_v45 = vld [vmem:[%s3575_s11] ss:$0 sm:$0xff] }
 0x539   : > { %2663 = vmatpush3.bf16.msra.mxu0 %v1110_v48  ;;  %v957_v49 = vpack.c.bf16 %v953_v47, %v953_v47  ;;  %2664 = vmatprep.mubr.msk.bf16.mxu0 %vm2970_vm1, %v2969_v8 }
 0x53a   : > { %v2876_v50 = vpop.eup %2875  ;;  %2676 = vmatprep.subr.bf16.mxu0 %v2969_v8 }
 0x53b   : > { %v954_v51 = vmul.f32 %v2876_v50, %v2868_v29  ;;  %2659 = vmatmul.mubr.msk.bf16.vlgmr.msra.gmra.mrb[12].mxu1 %vm703_vm2, %v957_v49 }
 0x53c   : > { %2672 = vmatprep.mubr.msk.bf16.mxu1 %vm2970_vm1, %v2969_v8  ;;  %2669 = vmatpush3.bf16.msra.mxu1 %v2839_v57 }
 0x53d   : > { %v958_v52 = vpack.c.bf16 %v954_v51, %v954_v51  ;;  %2670 = vmatprep.subr.bf16.mxu1 %v2969_v8 }
 0x540   : > { %2665 = vmatmul.mubr.msk.bf16.vlgmr.msra.gmra.mrb[16].mxu0 %vm703_vm2, %v958_v52  ;;  %2671 = vmatpush3.bf16.msra.mxu1 %v2840_v58 }
 0x541   : > { %2680 = vmatprep.mubr.msk.bf16.mxu0 %vm2970_vm1, %v2969_v8  ;;  %2684 = vmatprep.subr.bf16.mxu1 %v2969_v8 }
 0x542   : > { %2677 = vmatpush3.bf16.msra.mxu0 %v2841_v31 }
 0x543   : > { %2678 = vmatprep.subr.bf16.mxu0 %v2969_v8 }
 0x5a5   : > { %v1002_v53 = vpop.f32.mrb[8].mxu1 }
 0x5a6   : > { %v2648_v54 = vpop.f32.mrb[9].mxu1 }
 0x5a7   : > { %v1005_v55 = vpop.f32.mrb[10].mxu1 }
 0x5a8   : > { %v2649_v56 = vpop.f32.mrb[11].mxu1 }
 0x60b   : > { %v1050_v59 = vpop.f32.mrb[12].mxu0 }
 0x60c   : > { %1153 = vrot.lane.b32.xlu0 %v1050_v59, %s3591_s24  ;;  %v2654_v60 = vpop.f32.mrb[13].mxu0  ;;  %s3614_s24 = smov 104  }
 0x60d   : > { %v1053_v61 = vpop.f32.mrb[14].mxu0 }
 0x60e   : > { %v2655_v62 = vpop.f32.mrb[15].mxu0  ;;  %v1098_v63 = vpop.f32.mrb[12].mxu1  ;;  %v2475_v61 = vld [vmem:[%s3577_s13] ss:$0 sm:$0xff] }
 0x60f   : > { %1157 = vrot.lane.b32.xlu1 %v1098_v63, %s3592_s29  ;;  %v2660_v1 = vpop.f32.mrb[13].mxu1 }
 0x610   : > { %v1101_v2 = vpop.f32.mrb[14].mxu1 }
 0x611   : > { %v2661_v3 = vpop.f32.mrb[15].mxu1 }
 0x613   : > { %v1146_v4 = vpop.f32.mrb[16].mxu0 }
 0x614   : > { %1161 = vrot.lane.b32.xlu0 %v1146_v4, %s3590_s21  ;;  %v2666_v5 = vpop.f32.mrb[17].mxu0  ;;  %s3615_s21 = smov 96  }
 0x615   : > { %v1149_v6 = vpop.f32.mrb[18].mxu0 }
 0x616   : > { %v2667_v7 = vpop.f32.mrb[19].mxu0 }
 0x67e   : > { %v1154_v9 = vpop.permute.xlu0 %1153 }
 0x67f   : > { %v1164_v11 = vsel %vm703_vm2, %v1002_v53, %v1154_v9 }
 0x681   : > { %v1158_v10 = vpop.permute.xlu1 %1157 }
 0x682   : > { %v1166_v12 = vsel %vm1165_vm4, %v1164_v11, %v1158_v10 }
 0x686   : > { %v1162_v13 = vpop.permute.xlu0 %1161 }
 0x687   : > { %v1168_v14 = vsel %vm1167_vm5, %v1166_v12, %v1162_v13  ;;  %v2847_v12 = vld [vmem:[%s3608_s4 + $0x10] sm:$0xff]   ;;  %v2848_v13 = vld [vmem:[%s3608_s4 + $0x18] sm:$0xff]  }
 0x688   : > { %v1169_v15 = vpack.c.bf16 %v1168_v14, %v1168_v14 }
 0x68a   : > { %2673 = vmatmul.mubr.msk.bf16.vlgmr.msra.gmra.mrb[16].mxu1 %vm590_vm0, %v1169_v15 }
 0x68b   : > { %2692 = vmatprep.mubr.msk.bf16.mxu1 %vm2970_vm1, %v2969_v8  ;;  %2685 = vmatpush3.bf16.msra.mxu1 %v2843_v40 }
 0x68c   : > { %2686 = vmatprep.subr.bf16.mxu1 %v2969_v8 }
 0x68f   : > { %2687 = vmatpush3.bf16.msra.mxu1 %v2844_v42 }
 0x690   : > { %2688 = vmatprep.subr.bf16.mxu1 %v2969_v8 }
 0x693   : > { %2689 = vmatpush3.bf16.msra.mxu1 %v2845_v43 }
 0x694   : > { %2690 = vmatprep.subr.bf16.mxu1 %v2969_v8 }
 0x697   : > { %2691 = vmatpush3.bf16.msra.mxu1 %v2846_v44 }
 0x698   : > { %2710 = vmatprep.subr.bf16.mxu1 %v2969_v8 }
 0x75d   : > { %v1230_v17 = vpop.f32.mrb[16].mxu1 }
 0x75e   : > { %v1231_v18 = vadd.f32 %v2465_v16, %v1230_v17  ;;  %v2674_v19 = vpop.f32.mrb[17].mxu1 }
 0x75f   : > { %v1233_v20 = vpop.f32.mrb[18].mxu1 }
 0x760   : > { %v3273_v21 = vadd.f32 %v1231_v18, %v3131_v0  ;;  %v2675_v22 = vpop.f32.mrb[19].mxu1  ;;  %v2842_v0 = vld [vmem:[%s3574_s10 + $0x8] sm:$0xff]   ;;  %v2483_v18 = vld [vmem:[%s3609_s19 + $0x1] ss:$0 sm:$0xff] }
 0x761   : > { %2679 = vmatpush3.bf16.msra.mxu0 %v2842_v0  ;;  %v2484_v20 = vld [vmem:[%s3610_s3 + $0x1] ss:$0 sm:$0xff]  ;;  %s2546_s3 = sshll.u32 %s3096_s0, 7 }
 0x762   : > { %v1239_v23 = vsel %vm590_vm0, %v3273_v21, 0.0  ;;  %2696 = vmatprep.subr.bf16.mxu0 %v2969_v8  ;;  %s3522_s4 = scalar_lea.hbm %s3582_s18, %s2546_s3 }
 0x763   : > { %1240 = vadd.xlane.f32.xlu1 %v1239_v23 }
 0x7f0   : > { %v1241_v24 = vpop.xlane.xlu1 %1240 }
 0x7f1   : > { %v1242_v25 = vmul.f32 0.03125, %v1241_v24  ;;  %v2490_v24 = vld [vmem:[%s3569_s5 + $0x1] ss:$0 sm:$0xff] }
 0x7f3   : > { %v1243_v26 = vsub.f32 %v3273_v21, %v1242_v25 }
 0x7f5   : > { %v1244_v27 = vmul.f32 %v1243_v26, %v1243_v26 }
 0x7f7   : > { %v1245_v29 = vsel %vm590_vm0, %v1244_v27, 0.0 }
 0x7f8   : > { %1246 = vadd.xlane.f32.xlu0 %v1245_v29 }
 0x885   : > { %v1247_v32 = vpop.xlane.xlu0 %1246 }
 0x886   : > { %v1248_v34 = vmul.f32 0.03125, %v1247_v32 }
 0x888   : > { %v1249_v35 = vadd.f32 1e-05, %v1248_v34 }
 0x88a   : > { %2877 = vrsqrt.f32 %v1249_v35 }
 0x894   : > { %v2878_v36 = vpop.eup %2877 }
 0x895   : > { %v1251_v38 = vmul.f32 %v2878_v36, %v1243_v26 }
 0x897   : > { %v1258_v39 = vmul.f32 %v2469_v37, %v1251_v38 }
 0x899   : > { %v1265_v33 = vadd.f32 %v2470_v30, %v1258_v39 }
 0x89b   : > { %v1266_v28 = vpack.c.bf16 %v1265_v33, %v1265_v33 }
 0x89d   : > { %2681 = vmatmul.mubr.msk.bf16.vlgmr.msra.gmra.mrb[20].mxu0 %vm590_vm0, %v1266_v28 }
 0x89e   : > { %2700 = vmatprep.mubr.msk.bf16.mxu0 %vm2970_vm1, %v2969_v8  ;;  %2697 = vmatpush3.bf16.msra.mxu0 %v2847_v12 }
 0x89f   : > { %2698 = vmatprep.subr.bf16.mxu0 %v2969_v8 }
 0x8a2   : > { %2699 = vmatpush3.bf16.msra.mxu0 %v2848_v13 }
 0x8a3   : > { %2704 = vmatprep.subr.bf16.mxu0 %v2969_v8 }
 0x970   : > { %v1327_v46 = vpop.f32.mrb[20].mxu0 }
 0x971   : > { %v1328_v47 = vadd.f32 %v2471_v45, %v1327_v46  ;;  %v2682_v48 = vpop.f32.mrb[21].mxu0 }
 0x972   : > { %v1330_v49 = vpop.f32.mrb[22].mxu0 }
 0x973   : > { %v1334_v50 = vmul.f32 0.044715, %v1328_v47  ;;  %v2683_v51 = vpop.f32.mrb[23].mxu0  ;;  %v1333_v57 = vmul.f32 0.5, %v1328_v47 }
 0x975   : > { %v1335_v52 = vmul.f32 %v1334_v50, %v1328_v47 }
 0x977   : > { %v1336_v53 = vmul.f32 %v1335_v52, %v1328_v47 }
 0x979   : > { %v1337_v54 = vadd.f32 %v1336_v53, %v1328_v47 }
 0x97b   : > { %v1338_v55 = vmul.f32 0.7978846, %v1337_v54 }
 0x97d   : > { %2879 = vtanh.f32 %v1338_v55 }
 0x987   : > { %v2880_v56 = vpop.eup %2879 }
 0x988   : > { %v1340_v58 = vadd.f32 1.0, %v2880_v56 }
 0x98a   : > { %v1341_v59 = vmul.f32 %v1340_v58, %v1333_v57 }
 0x98c   : > { %v1342_v60 = vpack.c.bf16 %v1341_v59, %v1341_v59 }
 0x98e   : > { %2693 = vmatmul.mubr.msk.bf16.vlgmr.msra.gmra.mrb[20].mxu1 %vm1382_vm6, %v1342_v60 }
 0x98f   : > { %2712 = vmatprep.mubr.msk.bf16.mxu1 %vm2970_vm1, %v2969_v8 }
 0xa61   : > { %v1420_v62 = vpop.f32.mrb[20].mxu1 }
 0xa62   : > { %v1421_v63 = vadd.f32 %v2475_v61, %v1420_v62  ;;  %v2694_v1 = vpop.f32.mrb[21].mxu1 }
 0xa63   : > { %v1423_v2 = vpop.f32.mrb[22].mxu1 }
 0xa64   : > { %v3322_v3 = vadd.f32 %v1421_v63, %v3273_v21  ;;  %v2695_v4 = vpop.f32.mrb[23].mxu1 }
 0xa66   : > { %v1431_v5 = vsel %vm590_vm0, %v3322_v3, 0.0 }
 0xa67   : > { %1432 = vadd.xlane.f32.xlu0 %v1431_v5 }
 0xaf4   : > { %v1433_v6 = vpop.xlane.xlu0 %1432 }
 0xaf5   : > { %v1434_v7 = vmul.f32 0.03125, %v1433_v6 }
 0xaf7   : > { %v1435_v9 = vsub.f32 %v3322_v3, %v1434_v7 }
 0xaf9   : > { %v1436_v10 = vmul.f32 %v1435_v9, %v1435_v9 }
 0xafb   : > { %v1437_v11 = vsel %vm590_vm0, %v1436_v10, 0.0 }
 0xafc   : > { %1438 = vadd.xlane.f32.xlu1 %v1437_v11 }
 0xb89   : > { %v1439_v14 = vpop.xlane.xlu1 %1438 }
 0xb8a   : > { %v1440_v15 = vmul.f32 0.03125, %v1439_v14 }
 0xb8c   : > { %v1441_v16 = vadd.f32 1e-05, %v1440_v15 }
 0xb8e   : > { %2881 = vrsqrt.f32 %v1441_v16 }
 0xb98   : > { %v2882_v17 = vpop.eup %2881 }
 0xb99   : > { %v1443_v19 = vmul.f32 %v2882_v17, %v1435_v9 }
 0xb9b   : > { %v1450_v21 = vmul.f32 %v2483_v18, %v1443_v19 }
 0xb9d   : > { %v1457_v22 = vadd.f32 %v2484_v20, %v1450_v21 }
 0xb9f   : > { %v1458_v23 = vpack.c.bf16 %v1457_v22, %v1457_v22 }
 0xba1   : > { %2701 = vmatmul.mubr.msk.bf16.vlgmr.msra.gmra.mrb[24].mxu0 %vm590_vm0, %v1458_v23 }
 0xba2   : > { %2706 = vmatprep.mubr.msk.bf16.mxu0 %vm2970_vm1, %v2969_v8 }
 0xc74   : > { %v1521_v25 = vpop.f32.mrb[24].mxu0 }
 0xc75   : > { %v1522_v26 = vadd.f32 %v2490_v24, %v1521_v25  ;;  %v2702_v27 = vpop.f32.mrb[25].mxu0 }
 0xc76   : > { %v1524_v29 = vpop.f32.mrb[26].mxu0 }
 0xc77   : > { %1531 = vrot.lane.b32.xlu1 %v1522_v26, %s3612_s25  ;;  %1528 = vrot.lane.b32.xlu0 %v1522_v26, %s3613_s26  ;;  %v2703_v31 = vpop.f32.mrb[27].mxu0  ;;  %v3350_v0 = vpack.c.bf16 %v1522_v26, %v1522_v26  ;;  %s3617_s26 = smov 16  }
 0xc7b   : > { %1534 = vrot.lane.b32.xlu1 %v1522_v26, %s3614_s24  ;;  %1542 = vrot.lane.b32.xlu0 %v3350_v0, %s3615_s21  ;;  %s3618_s24 = smov 8  }
 0xce9   : > { %v1532_v32 = vpop.permute.xlu1 %1531  ;;  %v1529_v34 = vpop.permute.xlu0 %1528 }
 0xcea   : > { %v3355_v35 = vpack.c.bf16 %v1532_v32, %v1532_v32  ;;  %v3357_v36 = vpack.c.bf16 %v1529_v34, %v1529_v34 }
 0xcec   : > { %1591 = vrot.lane.b32.xlu1 %v3357_v36, %s3615_s21  ;;  %1640 = vrot.lane.b32.xlu0 %v3355_v35, %s3615_s21 }
 0xced   : > { %v1535_v37 = vpop.permute.xlu1 %1534  ;;  %v1543_v38 = vpop.permute.xlu0 %1542 }
 0xcee   : > { %v3363_v30 = vpack.c.bf16 %v1535_v37, %v1535_v37  ;;  %v1548_v39 = vsel %vm703_vm2, %v1543_v38, 0 }
 0xcef   : > { %2705 = vmatpush3.bf16.xpose.msra.mxu0 %v1548_v39 }
 0xcf0   : > { %1689 = vrot.lane.b32.xlu1 %v3363_v30, %s3615_s21  ;;  %2716 = vmatprep.subr.bf16.mxu0 %v2969_v8  ;;  %s3619_s21 = smov 24  }
 0xcf6   : > { %2707 = vmatmul.mubr.msk.bf16.vlgmr.msra.gmra.mrb[28].mxu0 %vm703_vm2, %v3350_v0 }
 0xcf7   : > { %2718 = vmatprep.mubr.msk.bf16.mxu0 %vm2970_vm1, %v2969_v8 }
 0xd5e   : > { %v1592_v33 = vpop.permute.xlu1 %1591  ;;  %v1641_v28 = vpop.permute.xlu0 %1640 }
 0xd5f   : > { %v1597_v40 = vsel %vm703_vm2, %v1592_v33, 0  ;;  %v1646_v42 = vsel %vm703_vm2, %v1641_v28, 0 }
 0xd60   : > { %2711 = vmatpush3.bf16.xpose.msra.mxu1 %v1597_v40  ;;  %2717 = vmatpush3.bf16.xpose.msra.mxu0 %v1646_v42 }
 0xd61   : > { %2722 = vmatprep.subr.bf16.mxu1 %v2969_v8  ;;  %2728 = vmatprep.subr.bf16.mxu0 %v2969_v8 }
 0xd62   : > { %v1690_v43 = vpop.permute.xlu1 %1689 }
 0xd63   : > { %v1695_v44 = vsel %vm703_vm2, %v1690_v43, 0 }
 0xd67   : > { %2713 = vmatmul.mubr.msk.bf16.vlgmr.msra.gmra.mrb[24].mxu1 %vm703_vm2, %v3357_v36  ;;  %2719 = vmatmul.mubr.msk.bf16.vlgmr.msra.gmra.mrb[32].mxu0 %vm703_vm2, %v3355_v35 }
 0xd68   : > { %2723 = vmatpush3.bf16.xpose.msra.mxu1 %v1695_v44  ;;  %2724 = vmatprep.mubr.msk.bf16.mxu1 %vm2970_vm1, %v2969_v8 }
 0xd69   : > { %2730 = vmatprep.mubr.msk.bf16.mxu0 %vm2970_vm1, %v2969_v8  ;;  %2734 = vmatprep.subr.bf16.mxu1 %v2969_v8 }
 0xd6f   : > { %2725 = vmatmul.mubr.msk.bf16.vlgmr.msra.gmra.mrb[28].mxu1 %vm703_vm2, %v3363_v30 }
 0xd70   : > { %2736 = vmatprep.mubr.msk.bf16.mxu1 %vm2970_vm1, %v2969_v8 }
 0xdc9   : > { %v1584_v45 = vpop.f32.mrb[28].mxu0 }
 0xdca   : > { %v1737_v46 = vmul.f32 0.35355338, %v1584_v45  ;;  %v2708_v47 = vpop.f32.mrb[29].mxu0 }
 0xdcb   : > { %v1587_v48 = vpop.f32.mrb[30].mxu0 }
 0xdcc   : > { %v2709_v49 = vpop.f32.mrb[31].mxu0  ;;  %v1741_v50 = vadd.f32 %v3210_v41, %v1737_v46 }
 0xdce   : > { %v1745_v51 = vsel %vm703_vm2, %v1741_v50, -inf }
 0xdcf   : > { %1746 = vmax.xlane.f32.xlu0 %v1745_v51 }
 0xe3a   : > { %v1633_v52 = vpop.f32.mrb[24].mxu1  ;;  %v1682_v53 = vpop.f32.mrb[32].mxu0 }
 0xe3b   : > { %v1738_v54 = vmul.f32 0.35355338, %v1633_v52  ;;  %v1739_v55 = vmul.f32 0.35355338, %v1682_v53  ;;  %v2714_v56 = vpop.f32.mrb[25].mxu1  ;;  %v2720_v57 = vpop.f32.mrb[33].mxu0 }
 0xe3c   : > { %v1636_v58 = vpop.f32.mrb[26].mxu1  ;;  %v1685_v59 = vpop.f32.mrb[34].mxu0 }
 0xe3d   : > { %v2715_v60 = vpop.f32.mrb[27].mxu1  ;;  %v2721_v61 = vpop.f32.mrb[35].mxu0  ;;  %v1742_v62 = vadd.f32 %v3210_v41, %v1738_v54  ;;  %v1743_v63 = vadd.f32 %v3210_v41, %v1739_v55  ;;  %v2849_v59 = vld [vmem:[%s3570_s6 + $0x10] sm:$0xff]  }
 0xe3e   : > { %v2850_v60 = vld [vmem:[%s3570_s6 + $0x18] sm:$0xff]  }
 0xe3f   : > { %v1748_v1 = vsel %vm703_vm2, %v1742_v62, -inf  ;;  %v1751_v2 = vsel %vm703_vm2, %v1743_v63, -inf }
 0xe40   : > { %1749 = vmax.xlane.f32.xlu1 %v1748_v1  ;;  %1752 = vmax.xlane.f32.xlu0 %v1751_v2 }
 0xe42   : > { %v1731_v4 = vpop.f32.mrb[28].mxu1 }
 0xe43   : > { %v1740_v5 = vmul.f32 0.35355338, %v1731_v4  ;;  %v2726_v6 = vpop.f32.mrb[29].mxu1 }
 0xe44   : > { %v1734_v7 = vpop.f32.mrb[30].mxu1 }
 0xe45   : > { %v2727_v9 = vpop.f32.mrb[31].mxu1  ;;  %v1744_v10 = vadd.f32 %v3210_v41, %v1740_v5 }
 0xe47   : > { %v1754_v11 = vsel %vm703_vm2, %v1744_v10, -inf }
 0xe48   : > { %1755 = vmax.xlane.f32.xlu0 %v1754_v11 }
 0xe51   : > { %1793 = vrot.lane.b32.xlu1 %v3350_v0, %s3616_s1 }
 0xe5c   : > { %v1747_v12 = vpop.xlane.xlu0 %1746 }
 0xe5d   : > { %v1757_v13 = vsub.f32 %v1741_v50, %v1747_v12 }
 0xe5f   : > { %v1761_v14 = vmul.f32 1.442695, %v1757_v13 }
 0xe61   : > { %2883 = vpow2.f32 %v1761_v14 }
 0xe6b   : > { %v2884_v15 = vpop.eup %2883 }
 0xe6c   : > { %v1769_v16 = vsel %vm703_vm2, %v2884_v15, 0.0 }
 0xe75   : > { %1770 = vadd.xlane.f32.xlu1 %v1769_v16 }
 0xecd   : > { %v1750_v17 = vpop.xlane.xlu1 %1749  ;;  %v1753_v18 = vpop.xlane.xlu0 %1752 }
 0xece   : > { %v1758_v19 = vsub.f32 %v1742_v62, %v1750_v17  ;;  %v1759_v20 = vsub.f32 %v1743_v63, %v1753_v18 }
 0xed0   : > { %v1763_v21 = vmul.f32 1.442695, %v1758_v19  ;;  %v1765_v41 = vmul.f32 1.442695, %v1759_v20  ;;  %v2507_v19 = vld [vmem:[%s3571_s7 + $0x1] ss:$0 sm:$0xff] }
 0xed1   : > { %v1794_v22 = vpop.permute.xlu1 %1793 }
 0xed2   : > { %2885 = vpow2.f32 %v1763_v21  ;;  %v1799_v23 = vsel %vm964_vm3, %v1794_v22, 0 }
 0xed3   : > { %2887 = vpow2.f32 %v1765_v41  ;;  %2729 = vmatpush3.bf16.msra.mxu0 %v1799_v23 }
 0xed4   : > { %2740 = vmatprep.subr.bf16.mxu0 %v2969_v8 }
 0xed5   : > { %v1756_v24 = vpop.xlane.xlu0 %1755 }
 0xed6   : > { %v1760_v25 = vsub.f32 %v1744_v10, %v1756_v24 }
 0xed8   : > { %v1767_v26 = vmul.f32 1.442695, %v1760_v25 }
 0xeda   : > { %2889 = vpow2.f32 %v1767_v26 }
 0xedc   : > { %v2886_v27 = vpop.eup %2885 }
 0xedd   : > { %v2888_v29 = vpop.eup %2887  ;;  %v1772_v31 = vsel %vm703_vm2, %v2886_v27, 0.0 }
 0xede   : > { %1773 = vadd.xlane.f32.xlu0 %v1772_v31  ;;  %v1775_v0 = vsel %vm703_vm2, %v2888_v29, 0.0 }
 0xedf   : > { %1776 = vadd.xlane.f32.xlu1 %v1775_v0 }
 0xee4   : > { %v2890_v32 = vpop.eup %2889 }
 0xee5   : > { %v1778_v34 = vsel %vm703_vm2, %v2890_v32, 0.0 }
 0xee6   : > { %1779 = vadd.xlane.f32.xlu0 %v1778_v34 }
 0xef0   : > { %1889 = vrot.lane.b32.xlu1 %v3355_v35, %s3616_s1 }
 0xef4   : > { %1937 = vrot.lane.b32.xlu1 %v3363_v30, %s3616_s1 }
 0xefc   : > { %1841 = vrot.lane.b32.xlu0 %v3357_v36, %s3616_s1 }
 0xf02   : > { %v1771_v37 = vpop.xlane.xlu1 %1770 }
 0xf03   : > { %2891 = vrcp.f32 %v1771_v37 }
 0xf0d   : > { %v2892_v38 = vpop.eup %2891 }
 0xf0e   : > { %v1785_v39 = vmul.f32 %v2892_v38, %v2884_v15 }
 0xf10   : > { %v1789_v33 = vpack.c.bf16 %v1785_v39, %v1785_v39 }
 0xf12   : > { %2731 = vmatmul.mubr.msk.bf16.vlgmr.msra.gmra.mrb[36].mxu0 %vm703_vm2, %v1789_v33  ;;  %v2513_v33 = vld [vmem:[%s3572_s8 + $0x1] ss:$0 sm:$0xff] }
 0xf13   : > { %2742 = vmatprep.mubr.msk.bf16.mxu0 %vm2970_vm1, %v2969_v8 }
 0xf6b   : > { %v1774_v28 = vpop.xlane.xlu0 %1773 }
 0xf6c   : > { %v1777_v40 = vpop.xlane.xlu1 %1776  ;;  %2893 = vrcp.f32 %v1774_v28 }
 0xf6d   : > { %2895 = vrcp.f32 %v1777_v40  ;;  %v2514_v40 = vld [vmem:[%s3573_s9 + $0x1] ss:$0 sm:$0xff] }
 0xf70   : > { %v1890_v35 = vpop.permute.xlu1 %1889 }
 0xf71   : > { %v1895_v30 = vsel %vm964_vm3, %v1890_v35, 0 }
 0xf72   : > { %2741 = vmatpush3.bf16.msra.mxu0 %v1895_v30 }
 0xf73   : > { %v1780_v42 = vpop.xlane.xlu0 %1779  ;;  %2752 = vmatprep.subr.bf16.mxu0 %v2969_v8 }
 0xf74   : > { %2897 = vrcp.f32 %v1780_v42  ;;  %v1938_v48 = vpop.permute.xlu1 %1937 }
 0xf75   : > { %v1943_v51 = vsel %vm964_vm3, %v1938_v48, 0 }
 0xf76   : > { %v2894_v36 = vpop.eup %2893 }
 0xf77   : > { %v2896_v43 = vpop.eup %2895  ;;  %v1786_v44 = vmul.f32 %v2894_v36, %v2886_v27  ;;  %v1842_v45 = vpop.permute.xlu0 %1841  ;;  %v2853_v36 = vld [vmem:[%s3576_s12 + $0x20] sm:$0xff]  }
 0xf78   : > { %v1787_v46 = vmul.f32 %v2896_v43, %v2888_v29  ;;  %v1847_v47 = vsel %vm964_vm3, %v1842_v45, 0  ;;  %v2854_v43 = vld [vmem:[%s3576_s12 + $0x28] sm:$0xff]   ;;  %v2856_v45 = vld [vmem:[%s3576_s12 + $0x38] sm:$0xff]  }
 0xf79   : > { %2735 = vmatpush3.bf16.msra.mxu1 %v1847_v47  ;;  %v1790_v49 = vpack.c.bf16 %v1786_v44, %v1786_v44  ;;  %v2855_v44 = vld [vmem:[%s3576_s12 + $0x30] sm:$0xff]  }
 0xf7a   : > { %v1791_v50 = vpack.c.bf16 %v1787_v46, %v1787_v46  ;;  %2746 = vmatprep.subr.bf16.mxu1 %v2969_v8  ;;  %v2520_v46 = vld [vmem:[%s3575_s11 + $0x1] ss:$0 sm:$0xff] }
 0xf7c   : > { %2743 = vmatmul.mubr.msk.bf16.vlgmr.msra.gmra.mrb[40].mxu0 %vm703_vm2, %v1791_v50  ;;  %2737 = vmatmul.mubr.msk.bf16.vlgmr.msra.gmra.mrb[32].mxu1 %vm703_vm2, %v1790_v49 }
 0xf7d   : > { %2747 = vmatpush3.bf16.msra.mxu1 %v1943_v51  ;;  %2748 = vmatprep.mubr.msk.bf16.mxu1 %vm2970_vm1, %v2969_v8 }
 0xf7e   : > { %v2898_v52 = vpop.eup %2897  ;;  %2756 = vmatprep.mubr.msk.bf16.mxu0 %vm2970_vm1, %v2969_v8  ;;  %2760 = vmatprep.subr.bf16.mxu1 %v2969_v8 }
 0xf7f   : > { %v1788_v53 = vmul.f32 %v2898_v52, %v2890_v32  ;;  %2753 = vmatpush3.bf16.msra.mxu0 %v2849_v59  ;;  %v2851_v32 = vld [vmem:[%s3574_s10 + $0x10] sm:$0xff]  }
 0xf80   : > { %2754 = vmatprep.subr.bf16.mxu0 %v2969_v8 }
 0xf81   : > { %v1792_v54 = vpack.c.bf16 %v1788_v53, %v1788_v53 }
 0xf83   : > { %2755 = vmatpush3.bf16.msra.mxu0 %v2850_v60 }
 0xf84   : > { %2749 = vmatmul.mubr.msk.bf16.vlgmr.msra.gmra.mrb[36].mxu1 %vm703_vm2, %v1792_v54  ;;  %2768 = vmatprep.subr.bf16.mxu0 %v2969_v8 }
 0xf85   : > { %2764 = vmatprep.mubr.msk.bf16.mxu1 %vm2970_vm1, %v2969_v8  ;;  %2761 = vmatpush3.bf16.msra.mxu1 %v2851_v32 }
 0xf86   : > { %2762 = vmatprep.subr.bf16.mxu1 %v2969_v8 }
 0xfe5   : > { %v1835_v55 = vpop.f32.mrb[36].mxu0 }
 0xfe6   : > { %v2732_v56 = vpop.f32.mrb[37].mxu0 }
 0xfe7   : > { %v1838_v57 = vpop.f32.mrb[38].mxu0 }
 0xfe8   : > { %v2733_v58 = vpop.f32.mrb[39].mxu0 }
0x104f   : > { %v1931_v61 = vpop.f32.mrb[40].mxu0  ;;  %v1883_v62 = vpop.f32.mrb[32].mxu1 }
0x1050   : > { %1990 = vrot.lane.b32.xlu1 %v1931_v61, %s3617_s26  ;;  %v2744_v63 = vpop.f32.mrb[41].mxu0  ;;  %1986 = vrot.lane.b32.xlu0 %v1883_v62, %s3618_s24  ;;  %v2738_v1 = vpop.f32.mrb[33].mxu1  ;;  %v2533_v62 = vld [vmem:[%s3577_s13 + $0x1] ss:$0 sm:$0xff]  ;;  %s575_s24 = sand.u32 1, %s2959_s28  }
0x1051   : > { %v1934_v2 = vpop.f32.mrb[42].mxu0  ;;  %v1886_v4 = vpop.f32.mrb[34].mxu1  ;;  %s2363_s1 = scalar_lea.sflag [#allocation3], %s575_s24 }
0x1052   : > { %v2745_v5 = vpop.f32.mrb[43].mxu0  ;;  %v2739_v6 = vpop.f32.mrb[35].mxu1 }
0x1057   : > { %v1979_v7 = vpop.f32.mrb[36].mxu1 }
0x1058   : > { %1994 = vrot.lane.b32.xlu0 %v1979_v7, %s3619_s21  ;;  %v2750_v9 = vpop.f32.mrb[37].mxu1  ;;  %s2448_s21 = sshll.u32 %s575_s24, 3 }
0x1059   : > { %v1982_v10 = vpop.f32.mrb[38].mxu1  ;;  %s577_s22 = scalar_lea.vmem [#allocation2], %s2448_s21  ;;  %s2979_s21 = smov [#allocation2]  }
0x105a   : > { %v2751_v11 = vpop.f32.mrb[39].mxu1  ;;  %s2376_s29 = sshll.u32 %s577_s22, 4  ;;  %s2909_s20 = sshll.u32 %s2979_s21, 4  ;;  %s3524_s29 = int_to_ptr.vmem [resolvable:$true] %s2376_s29  ;;  %s2910_s20 = int_to_ptr.vmem [resolvable:$false] %s2909_s20 }
0x105b   : > { %s2905_s0 = scalar_lea.vmem %s3524_s29, 128  ;;  %s2911_s25 = scalar_lea.vmem %s2910_s20, 256 }
0x105c   : > { %p2906_p11 = scmp.ne.s32.totalorder %s3524_s29, %s2905_s0  ;;  %p2912_p0 = scmp.lt.s32.totalorder %s3524_s29, %s2910_s20 }
0x105d   : > { %p2913_p1 = scmp.lt.s32.totalorder %s2911_s25, %s2905_s0 }
0x105e   : > { %p2907_p12 = pnand %p2906_p11, %p3113_p5 }
0x105f   : > { %p2914_p2 = por %p2913_p1, %p2912_p0 }
0x1060   : > { %p2908_p13 = pneg %p2907_p12 }
0x1062   : > { %p2915_p3 = pnand %p2914_p2, %p2908_p13 }
0x10c2   : > { %v1987_v12 = vpop.permute.xlu0 %1986  ;;  %v1991_v14 = vpop.permute.xlu1 %1990 }
0x10c3   : > { %v1997_v13 = vsel %vm703_vm2, %v1835_v55, %v1987_v12 }
0x10c4   : > { %v1998_v16 = vsel %vm1165_vm4, %v1997_v13, %v1991_v14  ;;  %v2857_v14 = vld [vmem:[%s3580_s16] sm:$0xff]  }
0x10ca   : > { %v1995_v15 = vpop.permute.xlu0 %1994 }
0x10cb   : > { %v1999_v17 = vsel %vm1167_vm5, %v1998_v16, %v1995_v15  ;;  %v2858_v15 = vld [vmem:[%s3580_s16 + $0x8] sm:$0xff]  }
0x10cc   : > { %v2000_v18 = vpack.c.bf16 %v1999_v17, %v1999_v17 }
0x10ce   : > { %2757 = vmatmul.mubr.msk.bf16.vlgmr.msra.gmra.mrb[44].mxu0 %vm590_vm0, %v2000_v18 }
0x10cf   : > { %2776 = vmatprep.mubr.msk.bf16.mxu0 %vm2970_vm1, %v2969_v8  ;;  %2769 = vmatpush3.bf16.msra.mxu0 %v2853_v36 }
0x10d0   : > { %2770 = vmatprep.subr.bf16.mxu0 %v2969_v8 }
0x10d3   : > { %2771 = vmatpush3.bf16.msra.mxu0 %v2854_v43 }
0x10d4   : > { %2772 = vmatprep.subr.bf16.mxu0 %v2969_v8 }
0x10d7   : > { %2773 = vmatpush3.bf16.msra.mxu0 %v2855_v44 }
0x10d8   : > { %2774 = vmatprep.subr.bf16.mxu0 %v2969_v8 }
0x10db   : > { %2775 = vmatpush3.bf16.msra.mxu0 %v2856_v45 }
0x11a1   : > { %v2063_v20 = vpop.f32.mrb[44].mxu0 }
0x11a2   : > { %v2064_v21 = vadd.f32 %v2507_v19, %v2063_v20  ;;  %v2758_v41 = vpop.f32.mrb[45].mxu0  ;;  %v2539_v20 = vld [vmem:[%s3578_s14] ss:$0 sm:$0xff] }
0x11a3   : > { %v2066_v22 = vpop.f32.mrb[46].mxu0  ;;  %v2540_v41 = vld [vmem:[%s3579_s15] ss:$0 sm:$0xff] }
0x11a4   : > { %v3452_v23 = vadd.f32 %v2064_v21, %v3322_v3  ;;  %v2759_v24 = vpop.f32.mrb[47].mxu0  ;;  %v2852_v3 = vld [vmem:[%s3574_s10 + $0x18] sm:$0xff]  }
0x11a5   : > { %2763 = vmatpush3.bf16.msra.mxu1 %v2852_v3 }
0x11a6   : > { %v2074_v25 = vsel %vm590_vm0, %v3452_v23, 0.0  ;;  %2780 = vmatprep.subr.bf16.mxu1 %v2969_v8 }
0x11a7   : > { %2075 = vadd.xlane.f32.xlu1 %v2074_v25 }
0x1234   : > { %v2076_v26 = vpop.xlane.xlu1 %2075 }
0x1235   : > { %v2077_v27 = vmul.f32 0.03125, %v2076_v26 }
0x1237   : > { %v2078_v29 = vsub.f32 %v3452_v23, %v2077_v27 }
0x1239   : > { %v2079_v31 = vmul.f32 %v2078_v29, %v2078_v29 }
0x123b   : > { %v2080_v0 = vsel %vm590_vm0, %v2079_v31, 0.0 }
0x123c   : > { %2081 = vadd.xlane.f32.xlu0 %v2080_v0 }
0x12c9   : > { %v2082_v34 = vpop.xlane.xlu0 %2081 }
0x12ca   : > { %v2083_v37 = vmul.f32 0.03125, %v2082_v34 }
0x12cc   : > { %v2084_v38 = vadd.f32 1e-05, %v2083_v37 }
0x12ce   : > { %2899 = vrsqrt.f32 %v2084_v38 }
0x12d8   : > { %v2900_v39 = vpop.eup %2899 }
0x12d9   : > { %v2086_v28 = vmul.f32 %v2900_v39, %v2078_v29 }
0x12db   : > { %v2093_v35 = vmul.f32 %v2513_v33, %v2086_v28 }
0x12dd   : > { %v2100_v30 = vadd.f32 %v2514_v40, %v2093_v35 }
0x12df   : > { %v2101_v42 = vpack.c.bf16 %v2100_v30, %v2100_v30 }
0x12e1   : > { %2765 = vmatmul.mubr.msk.bf16.vlgmr.msra.gmra.mrb[40].mxu1 %vm590_vm0, %v2101_v42 }
0x12e2   : > { %2784 = vmatprep.mubr.msk.bf16.mxu1 %vm2970_vm1, %v2969_v8  ;;  %2781 = vmatpush3.bf16.msra.mxu1 %v2857_v14 }
0x12e3   : > { %2782 = vmatprep.subr.bf16.mxu1 %v2969_v8  ;;  %v2541_v8 = vld [vmem:[%s3581_s17] ss:$0 sm:$0xff] }
0x12e6   : > { %2783 = vmatpush3.bf16.msra.mxu1 %v2858_v15 }
0x13b4   : > { %v2164_v47 = vpop.f32.mrb[40].mxu1 }
0x13b5   : > { %v2165_v48 = vadd.f32 %v2520_v46, %v2164_v47  ;;  %v2766_v49 = vpop.f32.mrb[41].mxu1 }
0x13b6   : > { %v2167_v50 = vpop.f32.mrb[42].mxu1 }
0x13b7   : > { %v2171_v51 = vmul.f32 0.044715, %v2165_v48  ;;  %v2767_v52 = vpop.f32.mrb[43].mxu1  ;;  %v2170_v58 = vmul.f32 0.5, %v2165_v48 }
0x13b9   : > { %v2172_v53 = vmul.f32 %v2171_v51, %v2165_v48 }
0x13bb   : > { %v2173_v54 = vmul.f32 %v2172_v53, %v2165_v48 }
0x13bd   : > { %v2174_v55 = vadd.f32 %v2173_v54, %v2165_v48 }
0x13bf   : > { %v2175_v56 = vmul.f32 0.7978846, %v2174_v55 }
0x13c1   : > { %2901 = vtanh.f32 %v2175_v56 }
0x13cb   : > { %v2902_v57 = vpop.eup %2901 }
0x13cc   : > { %v2177_v59 = vadd.f32 1.0, %v2902_v57 }
0x13ce   : > { %v2178_v60 = vmul.f32 %v2177_v59, %v2170_v58 }
0x13d0   : > { %v2179_v61 = vpack.c.bf16 %v2178_v60, %v2178_v60 }
0x13d2   : > { %2777 = vmatmul.mubr.msk.bf16.vlgmr.msra.gmra.mrb[48].mxu0 %vm1382_vm6, %v2179_v61 }
0x14a5   : > { %v2258_v63 = vpop.f32.mrb[48].mxu0 }
0x14a6   : > { %v2259_v1 = vadd.f32 %v2533_v62, %v2258_v63  ;;  %v2778_v2 = vpop.f32.mrb[49].mxu0 }
0x14a7   : > { %v2261_v4 = vpop.f32.mrb[50].mxu0 }
0x14a8   : > { %v2779_v5 = vpop.f32.mrb[51].mxu0  ;;  %v2264_v6 = vadd.f32 %v2259_v1, %v3452_v23 }
0x14aa   : > { %v2267_v7 = vsel %vm590_vm0, %v2264_v6, 0.0 }
0x14ab   : > { %2268 = vadd.xlane.f32.xlu0 %v2267_v7 }
0x1538   : > { %v2269_v9 = vpop.xlane.xlu0 %2268 }
0x1539   : > { %v2270_v10 = vmul.f32 0.03125, %v2269_v9 }
0x153b   : > { %v2271_v11 = vsub.f32 %v2264_v6, %v2270_v10 }
0x153d   : > { %v2272_v12 = vmul.f32 %v2271_v11, %v2271_v11 }
0x153f   : > { %v2273_v13 = vsel %vm590_vm0, %v2272_v12, 0.0 }
0x1540   : > { %2274 = vadd.xlane.f32.xlu1 %v2273_v13 }
0x15cd   : > { %v2275_v16 = vpop.xlane.xlu1 %2274 }
0x15ce   : > { %v2276_v17 = vmul.f32 0.03125, %v2275_v16 }
0x15d0   : > { %v2277_v18 = vadd.f32 1e-05, %v2276_v17 }
0x15d2   : > { %2903 = vrsqrt.f32 %v2277_v18 }
0x15dc   : > { %v2904_v19 = vpop.eup %2903 }
0x15dd   : > { %v2279_v21 = vmul.f32 %v2904_v19, %v2271_v11 }
0x15df   : > { %v2286_v22 = vmul.f32 %v2539_v20, %v2279_v21 }
0x15e1   : > { %v2293_v23 = vadd.f32 %v2540_v41, %v2286_v22 }
0x15e3   : > { %v2294_v24 = vpack.c.bf16 %v2293_v23, %v2293_v23 }
0x15e5   : > { %2785 = vmatmul.mubr.msk.bf16.vlgmr.msra.gmra.mrb[44].mxu1 %vm590_vm0, %v2294_v24 }
0x16b8   : > { %v2355_v25 = vpop.f32.mrb[44].mxu1 }
0x16b9   : > { %v2356_v26 = vadd.f32 %v2541_v8, %v2355_v25  ;;  %v2786_v27 = vpop.f32.mrb[45].mxu1 }
0x16ba   : > { %v2358_v29 = vpop.f32.mrb[46].mxu1 }
0x16bb   : > { %2361 = vst [vmem:[%s577_s22] sm:$0xff] %v2356_v26  ;;  %v2787_v31 = vpop.f32.mrb[47].mxu1 }
0x16bc   : > { %2918 = shalt.err (!%p2915_p3)
}
0x16bd   : > { %s2919_s3 = scalar_lea.hbm %s3522_s4, 128  ;;  %s2923_s26 = scalar_lea.hbm %s3582_s18, 256 }
0x16be   : > { %p2920_p4 = scmp.ne.s32.totalorder %s3522_s4, %s2919_s3  ;;  %p2924_p9 = scmp.lt.u32.totalorder %s3522_s4, %s3582_s18 }
0x16bf   : > { %p2925_p10 = scmp.lt.u32.totalorder %s2923_s26, %s2919_s3  ;;  %p2927_p12 = scmp.lt.u32.totalorder %s2919_s3, %s3522_s4 }
0x16c0   : > { %p2921_p7 = pnand %p2920_p4, %p3113_p5 }
0x16c1   : > { %p2926_p11 = por %p2925_p10, %p2924_p9 }
0x16c2   : > { %p2922_p8 = pneg %p2921_p7 }
0x16c3   : > { %p2928_p13 = por %p2927_p12, %p2926_p11 }
0x16c5   : > { %p2929_p0 = pnand %p2928_p13, %p2922_p8 }
0x16c7   : > { %2932 = shalt.err (!%p2929_p0)
}
0x16c8   : > { %2788 = dma.vmem_to_hbm [thread:$0]  (%p3113_p5), %s3524_s29, 128, %s3522_s4, %s2363_s1  }
0x16c9 PF: > { %p2794_p1 = scmp.ge.s32.totalorder %s2967_s30, 2  ;;  %s2388_s0 = sand.u32 1, %s2955_s27  }
0x16ca   : > { %s2389_s25 = scalar_lea.sflag [#allocation3], %s2388_s0 }
0x16cb   : > { %p2791_p2 = pnand %p2794_p1, %p3117_p6 }
0x16cd   : > { %2950 = dma.done.wait (!%p2791_p2), %s2389_s25, 128  }
0x16ce   : > { %2952 = vsyncadd (!%p2791_p2), %s2389_s25, 4294967168  ;;  %s3620_s30 = sld [smem:[#allocation6_spill]]  ;;  %s3621_s3 = sld [smem:[#allocation5_spill]] }
0x16cf   : > { %s3622_s29 = sld [smem:[#allocation7_spill]]  ;;  %s3623_s27 = smov %s2959_s28 }
0x16d4   : > { %p28_p3 = scmp.ge.s32.totalorder %s3620_s30, 4   ;;  %s3624_s28 = smov %s3621_s3 }
0x16d6   :  { %30 = sbr.rel (!%p28_p3) target bundleno = 9 (0x9), region = 142 }
0x16dd   :  { %2394 = vsyncpa [#allocation3], 1 }
0x16de   :  { %2396 = vsyncpa [#allocation3 + $0x1], 1 }

</bundles_post_ra>
